<compile_context>
chip_gen: v7x
topology: tpu7x:2x2x1
jax: 0.10.0
libtpu: 0.0.40
codegen_flags: <defaults>
</compile_context>

<pallas_src>
import functools

import jax
import jax.numpy as jnp
from jax import lax
from jax.experimental import pallas as pl
from jax.experimental.pallas import tpu as pltpu

IN_DIM = 28 * 28          # 784
HIDDEN = 512
N_OUT = 10
N_PAD = 128               # lane-dense output width
NEG_PAD = -1e30           # padded-logit bias -> exp() underflows to 0 (f32 only!)

# ~0.35 us per grid step expressed in "equivalent MXU rows" of this MLP,
# used to trade batch-padding waste against per-step pipeline overhead.
_STEP_OVERHEAD_ROWS = 192


def _round_up(x, m):
    return (x + m - 1) // m * m


def _choose_tiling(B):
    """Pick (TILE_B, B_pad).

    Goals: >= 2 grid steps whenever B > 128 (v7x megacore), minimal batch
    padding, and tiles large enough to amortize per-step pipeline overhead.
    """
    if B <= 128:
        tile = _round_up(max(B, 8), 8)
        return tile, tile
    best_tile, best_pad, best_cost = None, None, None
    for tile in (1024, 512, 256, 128):
        b_pad = _round_up(B, tile)
        steps = b_pad // tile
        if steps < 2:          # keep both TensorCores busy on v7x
            continue
        cost = (b_pad - B) + steps * _STEP_OVERHEAD_ROWS
        if (best_cost is None or cost < best_cost
                or (cost == best_cost and tile > best_tile)):
            best_tile, best_pad, best_cost = tile, b_pad, cost
    return best_tile, best_pad


def mlp_kernel(x_ref, w1_ref, b1_ref, w2_ref, b2_ref, w3_ref, b3_ref, o_ref,
               *, chunk, n_chunks):
    """One batch tile. x_ref is f32 (TILE_B, 784); weights are bf16.

    The tile is processed in `n_chunks` row sub-chunks (unrolled) so the MXU
    work of one chunk overlaps the VPU/EUP epilogue of the previous one.
    """

    def one_chunk(c, carry):
        r = pl.multiple_of(c * chunk, chunk)
        # fc1 + ReLU   (in-kernel bf16 cast; f32 accumulation on the MXU)
        x = x_ref[pl.ds(r, chunk), :].astype(jnp.bfloat16)
        h1 = jnp.dot(x, w1_ref[...], preferred_element_type=jnp.float32)
        h1 = jnp.maximum(h1 + b1_ref[...], 0.0)
        # fc2 + ReLU
        h2 = jnp.dot(h1.astype(jnp.bfloat16), w2_ref[...],
                     preferred_element_type=jnp.float32)
        h2 = jnp.maximum(h2 + b2_ref[...], 0.0)
        # fc3 (N padded to 128; padded lanes get -1e30 bias).  Must stay f32.
        logits = jnp.dot(h2.astype(jnp.bfloat16), w3_ref[...],
                         preferred_element_type=jnp.float32)
        logits = logits + b3_ref[...]
        # log_softmax along last axis (padded lanes contribute exp(-1e30)=0)
        m = jnp.max(logits, axis=-1, keepdims=True)
        shifted = logits - m
        lse = jnp.log(jnp.sum(jnp.exp(shifted), axis=-1, keepdims=True))
        o_ref[pl.ds(r, chunk), :] = (shifted - lse).astype(o_ref.dtype)
        return carry

    lax.fori_loop(0, n_chunks, one_chunk, 0, unroll=True)


def _prepare_params(params):
    """Cast / pad raw f32 params ([in,out] weights, [1,out] biases)."""
    w1, b1, w2, b2, w3, b3 = params
    w1p = w1.astype(jnp.bfloat16)                                   # (784, 512)
    w2p = w2.astype(jnp.bfloat16)                                   # (512, 512)
    w3p = jnp.pad(w3, ((0, 0), (0, N_PAD - N_OUT))).astype(jnp.bfloat16)
    b1p = b1.astype(jnp.float32)
    b2p = b2.astype(jnp.float32)
    # Padded-lane bias = -1e30; only valid while b3 / logits remain float32.
    b3p = jnp.pad(b3.astype(jnp.float32), ((0, 0), (0, N_PAD - N_OUT)),
                  constant_values=NEG_PAD)
    return w1p, b1p, w2p, b2p, w3p, b3p


def mlp_forward(x, params):
    """x: [B, 1, 28, 28] or [B, 784] float32. Returns log-probs [B, 10] (f32)."""
    w1p, b1p, w2p, b2p, w3p, b3p = _prepare_params(params)

    xf = x.reshape(-1, IN_DIM).astype(jnp.float32)   # == torch x.view(-1, 784)
    B = xf.shape[0]

    tile_b, b_pad = _choose_tiling(B)
    if b_pad != B:                                    # single (optional) pad pass
        xf = jnp.pad(xf, ((0, b_pad - B), (0, 0)))

    n_chunks = 2 if tile_b >= 256 else 1
    chunk = tile_b // n_chunks
    grid = (b_pad // tile_b,)

    in_specs = [
        pl.BlockSpec((tile_b, IN_DIM), lambda i: (i, 0)),   # x tile (pipelined, f32)
        pl.BlockSpec((IN_DIM, HIDDEN), lambda i: (0, 0)),   # w1 (VMEM-resident)
        pl.BlockSpec((1, HIDDEN), lambda i: (0, 0)),        # b1
        pl.BlockSpec((HIDDEN, HIDDEN), lambda i: (0, 0)),   # w2
        pl.BlockSpec((1, HIDDEN), lambda i: (0, 0)),        # b2
        pl.BlockSpec((HIDDEN, N_PAD), lambda i: (0, 0)),    # w3 (lane-padded)
        pl.BlockSpec((1, N_PAD), lambda i: (0, 0)),         # b3 (lane-padded)
    ]
    out_specs = pl.BlockSpec((tile_b, N_PAD), lambda i: (i, 0))

    weight_bytes = 2 * (IN_DIM * HIDDEN + HIDDEN * HIDDEN + HIDDEN * N_PAD)
    bias_bytes = 4 * (2 * HIDDEN + N_PAD)
    cost = pl.CostEstimate(
        flops=2 * b_pad * (IN_DIM * HIDDEN + HIDDEN * HIDDEN + HIDDEN * N_PAD),
        transcendentals=b_pad * N_PAD,
        bytes_accessed=b_pad * IN_DIM * 4          # f32 activations in
        + weight_bytes + bias_bytes
        + b_pad * N_PAD * 4,                       # f32 log-probs out
    )

    kernel = functools.partial(mlp_kernel, chunk=chunk, n_chunks=n_chunks)

    out = pl.pallas_call(
        kernel,
        out_shape=jax.ShapeDtypeStruct((b_pad, N_PAD), jnp.float32),
        grid=grid,
        in_specs=in_specs,
        out_specs=out_specs,
        compiler_params=pltpu.CompilerParams(
            dimension_semantics=("parallel",),
            vmem_limit_bytes=32 * 1024 * 1024,
        ),
        cost_estimate=cost,
    )(xf, w1p, b1p, w2p, b2p, w3p, b3p)

    # Padded batch rows / padded lanes carry garbage — never expose them.
    return out[:B, :N_OUT]


def init_params(key):
    """Deterministic init mimicking PyTorch Linear default (U(-1/sqrt(in), 1/sqrt(in))).
    Weights are stored pre-transposed as [in, out]; biases as [1, out]."""
    dims = [(IN_DIM, HIDDEN), (HIDDEN, HIDDEN), (HIDDEN, N_OUT)]
    params = []
    keys = jax.random.split(key, 2 * len(dims))
    for i, (fan_in, fan_out) in enumerate(dims):
        bound = 1.0 / (fan_in ** 0.5)
        w = jax.random.uniform(keys[2 * i], (fan_in, fan_out), jnp.float32,
                               minval=-bound, maxval=bound)
        b = jax.random.uniform(keys[2 * i + 1], (1, fan_out), jnp.float32,
                               minval=-bound, maxval=bound)
        params += [w, b]
    return tuple(params)


if __name__ == "__main__":
    key = jax.random.PRNGKey(0)
    k_param, k_x = jax.random.split(key)
    params = init_params(k_param)

    # Small MNIST-like batch.
    x = jax.random.normal(k_x, (8, 1, 28, 28), dtype=jnp.float32)

    out = jax.block_until_ready(mlp_forward(x, params))

    # Reference with matching bf16 matmul operands / f32 accumulation.
    w1, b1, w2, b2, w3, b3 = params
    xf = x.reshape(-1, IN_DIM)

    def bdot(a, b):
        return jnp.dot(a.astype(jnp.bfloat16), b.astype(jnp.bfloat16),
                       preferred_element_type=jnp.float32)

    h1 = jnp.maximum(bdot(xf, w1) + b1, 0.0)
    h2 = jnp.maximum(bdot(h1, w2) + b2, 0.0)
    logits = bdot(h2, w3) + b3
    ref = jax.nn.log_softmax(logits, axis=-1)

    assert out.shape == (8, 10)
    assert jnp.allclose(out, ref, atol=2e-3, rtol=2e-3), "mismatch vs reference"

    print("KERNEL_OK")
</pallas_src>

<mosaic_0001>
module attributes {stable_mosaic.version = 11 : i64} {
  func.func @mlp_kernel(%arg0: i32, %arg1: memref<8x784xf32, #tpu.memory_space<vmem>>, %arg2: memref<784x512xbf16, #tpu.memory_space<vmem>>, %arg3: memref<1x512xf32, #tpu.memory_space<vmem>>, %arg4: memref<512x512xbf16, #tpu.memory_space<vmem>>, %arg5: memref<1x512xf32, #tpu.memory_space<vmem>>, %arg6: memref<512x128xbf16, #tpu.memory_space<vmem>>, %arg7: memref<1x128xf32, #tpu.memory_space<vmem>>, %arg8: memref<8x128xf32, #tpu.memory_space<vmem>>) attributes {dimension_semantics = [#tpu.dimension_semantics<parallel>], iteration_bounds = array<i64: 1>, scalar_prefetch = 0 : i64, scratch_operands = 0 : i64, tpu.core_type = #tpu.core_type<tc>, window_params = [{transform_indices = @transform_0, window_bounds = array<i64: 8, 784>}, {pipeline_mode = #tpu.pipeline_mode<synchronous>, transform_indices = @transform_1, window_bounds = array<i64: 784, 512>}, {pipeline_mode = #tpu.pipeline_mode<synchronous>, transform_indices = @transform_2, window_bounds = array<i64: 1, 512>}, {pipeline_mode = #tpu.pipeline_mode<synchronous>, transform_indices = @transform_3, window_bounds = array<i64: 512, 512>}, {pipeline_mode = #tpu.pipeline_mode<synchronous>, transform_indices = @transform_4, window_bounds = array<i64: 1, 512>}, {pipeline_mode = #tpu.pipeline_mode<synchronous>, transform_indices = @transform_5, window_bounds = array<i64: 512, 128>}, {pipeline_mode = #tpu.pipeline_mode<synchronous>, transform_indices = @transform_6, window_bounds = array<i64: 1, 128>}, {transform_indices = @transform_7, window_bounds = array<i64: 8, 128>}]} {
    %c0_i32 = arith.constant 0 : i32
    %c8_i32 = arith.constant 8 : i32
    %0 = arith.muli %c0_i32, %c8_i32 : i32
    %1 = tpu.assume_multiple %0, 8 : i32
    %2 = arith.index_cast %1 : i32 to index
    %c0 = arith.constant 0 : index
    %3 = vector.load %arg1[%2, %c0] : memref<8x784xf32, #tpu.memory_space<vmem>>, vector<8x784xf32>
    %4 = arith.truncf %3 : vector<8x784xf32> to vector<8x784xbf16>
    %c0_0 = arith.constant 0 : index
    %c0_1 = arith.constant 0 : index
    %5 = vector.load %arg2[%c0_0, %c0_1] : memref<784x512xbf16, #tpu.memory_space<vmem>>, vector<784x512xbf16>
    %cst = arith.constant dense<0.000000e+00> : vector<8x512xf32>
    %6 = tpu.matmul %4, %5, %cst {dimension_numbers = #tpu.dot_dimension_numbers<[1], [0], [0], [1], [0, 0, 1, 1], [], []>} : vector<8x784xbf16>, vector<784x512xbf16>, vector<8x512xf32> -> vector<8x512xf32>
    %c0_2 = arith.constant 0 : index
    %c0_3 = arith.constant 0 : index
    %7 = vector.load %arg3[%c0_2, %c0_3] : memref<1x512xf32, #tpu.memory_space<vmem>>, vector<1x512xf32>
    %8 = vector.broadcast %7 : vector<1x512xf32> to vector<8x512xf32>
    %9 = arith.addf %6, %8 : vector<8x512xf32>
    %cst_4 = arith.constant 0.000000e+00 : f32
    %10 = vector.broadcast %cst_4 : f32 to vector<8x512xf32>
    %11 = arith.maximumf %9, %10 : vector<8x512xf32>
    %12 = arith.truncf %11 : vector<8x512xf32> to vector<8x512xbf16>
    %c0_5 = arith.constant 0 : index
    %c0_6 = arith.constant 0 : index
    %13 = vector.load %arg4[%c0_5, %c0_6] : memref<512x512xbf16, #tpu.memory_space<vmem>>, vector<512x512xbf16>
    %cst_7 = arith.constant dense<0.000000e+00> : vector<8x512xf32>
    %14 = tpu.matmul %12, %13, %cst_7 {dimension_numbers = #tpu.dot_dimension_numbers<[1], [0], [0], [1], [0, 0, 1, 1], [], []>} : vector<8x512xbf16>, vector<512x512xbf16>, vector<8x512xf32> -> vector<8x512xf32>
    %c0_8 = arith.constant 0 : index
    %c0_9 = arith.constant 0 : index
    %15 = vector.load %arg5[%c0_8, %c0_9] : memref<1x512xf32, #tpu.memory_space<vmem>>, vector<1x512xf32>
    %16 = vector.broadcast %15 : vector<1x512xf32> to vector<8x512xf32>
    %17 = arith.addf %14, %16 : vector<8x512xf32>
    %cst_10 = arith.constant 0.000000e+00 : f32
    %18 = vector.broadcast %cst_10 : f32 to vector<8x512xf32>
    %19 = arith.maximumf %17, %18 : vector<8x512xf32>
    %20 = arith.truncf %19 : vector<8x512xf32> to vector<8x512xbf16>
    %c0_11 = arith.constant 0 : index
    %c0_12 = arith.constant 0 : index
    %21 = vector.load %arg6[%c0_11, %c0_12] : memref<512x128xbf16, #tpu.memory_space<vmem>>, vector<512x128xbf16>
    %cst_13 = arith.constant dense<0.000000e+00> : vector<8x128xf32>
    %22 = tpu.matmul %20, %21, %cst_13 {dimension_numbers = #tpu.dot_dimension_numbers<[1], [0], [0], [1], [0, 0, 1, 1], [], []>} : vector<8x512xbf16>, vector<512x128xbf16>, vector<8x128xf32> -> vector<8x128xf32>
    %c0_14 = arith.constant 0 : index
    %c0_15 = arith.constant 0 : index
    %23 = vector.load %arg7[%c0_14, %c0_15] : memref<1x128xf32, #tpu.memory_space<vmem>>, vector<1x128xf32>
    %24 = vector.broadcast %23 : vector<1x128xf32> to vector<8x128xf32>
    %25 = arith.addf %22, %24 : vector<8x128xf32>
    %cst_16 = arith.constant dense<0xFF800000> : vector<8xf32>
    %26 = vector.multi_reduction <maximumf>, %25, %cst_16 [1] : vector<8x128xf32> to vector<8xf32>
    %27 = vector.shape_cast %26 : vector<8xf32> to vector<8x1xf32>
    %28 = vector.broadcast %27 : vector<8x1xf32> to vector<8x128xf32>
    %29 = arith.subf %25, %28 : vector<8x128xf32>
    %30 = math.exp %29 : vector<8x128xf32>
    %cst_17 = arith.constant dense<0.000000e+00> : vector<8xf32>
    %31 = vector.multi_reduction <add>, %30, %cst_17 [1] : vector<8x128xf32> to vector<8xf32>
    %32 = vector.shape_cast %31 : vector<8xf32> to vector<8x1xf32>
    %33 = math.log %32 : vector<8x1xf32>
    %34 = vector.broadcast %33 : vector<8x1xf32> to vector<8x128xf32>
    %35 = arith.subf %29, %34 : vector<8x128xf32>
    %36 = arith.index_cast %1 : i32 to index
    %c0_18 = arith.constant 0 : index
    %37 = vector.load %arg8[%36, %c0_18] : memref<8x128xf32, #tpu.memory_space<vmem>>, vector<8x128xf32>
    tpu.vector_store %arg8[%36, %c0_18], %35 {strides = array<i32>} : memref<8x128xf32, #tpu.memory_space<vmem>>, vector<8x128xf32>,
    %c1_i32 = arith.constant 1 : i32
    return
  }
  func.func @transform_0(%arg0: i32) -> (i32, i32) {
    %c0_i32 = arith.constant 0 : i32
    %c0_i32_0 = arith.constant 0 : i32
    return %arg0, %c0_i32 : i32, i32
  }
  func.func @transform_1(%arg0: i32) -> (i32, i32) {
    %c0_i32 = arith.constant 0 : i32
    %c0_i32_0 = arith.constant 0 : i32
    %c0_i32_1 = arith.constant 0 : i32
    return %c0_i32, %c0_i32_0 : i32, i32
  }
  func.func @transform_2(%arg0: i32) -> (i32, i32) {
    %c0_i32 = arith.constant 0 : i32
    %c0_i32_0 = arith.constant 0 : i32
    %c0_i32_1 = arith.constant 0 : i32
    return %c0_i32, %c0_i32_0 : i32, i32
  }
  func.func @transform_3(%arg0: i32) -> (i32, i32) {
    %c0_i32 = arith.constant 0 : i32
    %c0_i32_0 = arith.constant 0 : i32
    %c0_i32_1 = arith.constant 0 : i32
    return %c0_i32, %c0_i32_0 : i32, i32
  }
  func.func @transform_4(%arg0: i32) -> (i32, i32) {
    %c0_i32 = arith.constant 0 : i32
    %c0_i32_0 = arith.constant 0 : i32
    %c0_i32_1 = arith.constant 0 : i32
    return %c0_i32, %c0_i32_0 : i32, i32
  }
  func.func @transform_5(%arg0: i32) -> (i32, i32) {
    %c0_i32 = arith.constant 0 : i32
    %c0_i32_0 = arith.constant 0 : i32
    %c0_i32_1 = arith.constant 0 : i32
    return %c0_i32, %c0_i32_0 : i32, i32
  }
  func.func @transform_6(%arg0: i32) -> (i32, i32) {
    %c0_i32 = arith.constant 0 : i32
    %c0_i32_0 = arith.constant 0 : i32
    %c0_i32_1 = arith.constant 0 : i32
    return %c0_i32, %c0_i32_0 : i32, i32
  }
  func.func @transform_7(%arg0: i32) -> (i32, i32) {
    %c0_i32 = arith.constant 0 : i32
    %c0_i32_0 = arith.constant 0 : i32
    return %arg0, %c0_i32 : i32, i32
  }
}

</mosaic_0001>

<bundles_post_ra>
// kernel: tpu_custom_call.1
= control target key start
LH: loop header
LB: loop body
LE: loop exit
PB: predicated region body
PF: predicated region fallthrough
CT: control target
= control target key end

     0   :  { %12 = vsyncpa [#allocation3], 0  ;;  %s4218_s0 = inlined_call_operand.hbm [shape: f32[8,784], index: 0, kind: input, shape index: {}]   ;;  %s4219_s1 = inlined_call_operand.hbm [shape: bf16[784,512], index: 1, kind: input, shape index: {}]   ;;  %s4220_s2 = inlined_call_operand.vmem [shape: f32[1,512], index: 2, kind: input, shape index: {}]   ;;  %s4221_s3 = inlined_call_operand.hbm [shape: bf16[512,512], index: 3, kind: input, shape index: {}]   ;;  %s4222_s4 = inlined_call_operand.vmem [shape: f32[1,512], index: 4, kind: input, shape index: {}]   ;;  %s4223_s5 = inlined_call_operand.hbm [shape: bf16[512,128], index: 5, kind: input, shape index: {}]   ;;  %s4224_s6 = inlined_call_operand.vmem [shape: f32[1,128], index: 6, kind: input, shape index: {}]   ;;  %s4225_s7 = inlined_call_operand.hbm [shape: f32[8,128], index: 7, kind: output, shape index: {}]  }
   0x1   :  { %13 = vsyncpa [#allocation6], 0 }
   0x2   :  { %14 = vsyncpa [#allocation9], 0 }
   0x3   :  { %15 = vsyncpa [#allocation4], 0  ;;  %s4062_s24 = smov [#allocation5]   ;;  %s3944_s28 = scalar_lea.hbm %s4219_s1, 25088 }
   0x4   :  { %s31_s25 = sshll.u32 %s4062_s24, 4  ;;  %p3945_p0 = scmp.ne.s32.totalorder %s4219_s1, %s3944_s28  ;;  %s32_s25 = int_to_ptr.vmem [resolvable:$true] %s31_s25 }
   0x5   :  { %p3948_p1 = scmp.lt.u32.totalorder %s3944_s28, %s4219_s1 }
   0x7   :  { %p3950_p2 = pnand %p3948_p1, %p3945_p0 }
   0x9   :  { %3953 = shalt.err (!%p3950_p2)
}
   0xa   :  { %s3954_s10 = scalar_lea.vmem %s32_s25, 25088  ;;  %p3959_p4 = scmp.lt.s32.totalorder %s32_s25, %s32_s25 }
   0xb   :  { %p3955_p3 = scmp.ne.s32.totalorder %s32_s25, %s3954_s10  ;;  %p3960_p5 = scmp.lt.s32.totalorder %s3954_s10, %s3954_s10 }
   0xd   :  { %p3961_p6 = por %p3960_p5, %p3959_p4 }
   0xf   :  { %p3962_p7 = pnand %p3961_p6, %p3955_p3 }
  0x11   :  { %3965 = shalt.err (!%p3962_p7)
}
  0x12   :  { %s4063_s11 = smov 256   ;;  %s4064_s12 = smov 16  }
  0x13   :  { %37 = dma.hbm_to_vmem [thread:$0]  %s4219_s1, 25088, %s32_s25, [#allocation6], %s4063_s11, %s4063_s11, %s4064_s12  }
  0x14   :  { %s4065_s15 = smov [#allocation2]   ;;  %s4066_s17 = smov [#allocation7]  }
  0x15   :  { %s22_s16 = sshll.u32 %s4065_s15, 4  ;;  %s45_s18 = sshll.u32 %s4066_s17, 4  ;;  %s23_s16 = int_to_ptr.vmem [resolvable:$true] %s22_s16  ;;  %s46_s18 = int_to_ptr.vmem [resolvable:$true] %s45_s18 }
  0x16   :  { %s3966_s21 = scalar_lea.hbm %s4218_s0, 896 }
  0x17   :  { %p3967_p8 = scmp.ne.s32.totalorder %s4218_s0, %s3966_s21  ;;  %p3970_p9 = scmp.lt.u32.totalorder %s3966_s21, %s4218_s0 }
  0x19   :  { %p3972_p10 = pnand %p3970_p9, %p3967_p8 }
  0x1b   :  { %3975 = shalt.err (!%p3972_p10)
}
  0x1c   :  { %s3976_s1 = scalar_lea.vmem %s23_s16, 896  ;;  %p3981_p12 = scmp.lt.s32.totalorder %s23_s16, %s23_s16 }
  0x1d   :  { %p3977_p11 = scmp.ne.s32.totalorder %s23_s16, %s3976_s1  ;;  %p3982_p13 = scmp.lt.s32.totalorder %s3976_s1, %s3976_s1 }
  0x1f   :  { %p3983_p0 = por %p3982_p13, %p3981_p12 }
  0x21   :  { %p3984_p1 = pnand %p3983_p0, %p3977_p11 }
  0x23   :  { %3987 = shalt.err (!%p3984_p1)
}
  0x24   :  { %25 = dma.hbm_to_vmem [thread:$0]  %s4218_s0, 896, %s23_s16, [#allocation3]  }
  0x25   :  { %s3988_s30 = scalar_lea.hbm %s4221_s3, 16384 }
  0x26   :  { %p3989_p2 = scmp.ne.s32.totalorder %s4221_s3, %s3988_s30  ;;  %p3992_p3 = scmp.lt.u32.totalorder %s3988_s30, %s4221_s3 }
  0x28   :  { %p3994_p4 = pnand %p3992_p3, %p3989_p2 }
  0x2a   :  { %3997 = shalt.err (!%p3994_p4)
}
  0x2b   :  { %s3998_s14 = scalar_lea.vmem %s46_s18, 16384  ;;  %p4003_p6 = scmp.lt.s32.totalorder %s46_s18, %s46_s18 }
  0x2c   :  { %p3999_p5 = scmp.ne.s32.totalorder %s46_s18, %s3998_s14  ;;  %p4004_p7 = scmp.lt.s32.totalorder %s3998_s14, %s3998_s14 }
  0x2e   :  { %p4005_p8 = por %p4004_p7, %p4003_p6 }
  0x30   :  { %p4006_p9 = pnand %p4005_p8, %p3999_p5 }
  0x32   :  { %4009 = shalt.err (!%p4006_p9)
}
  0x33   :  { %51 = dma.hbm_to_vmem [thread:$0]  %s4221_s3, 16384, %s46_s18, [#allocation6], %s4063_s11, %s4063_s11, %s4064_s12  }
  0x34   :  { %s4067_s16 = smov [#allocation8]   ;;  %s4010_s21 = scalar_lea.hbm %s4223_s5, 4096 }
  0x35   :  { %s59_s17 = sshll.u32 %s4067_s16, 4  ;;  %p4011_p10 = scmp.ne.s32.totalorder %s4223_s5, %s4010_s21  ;;  %s60_s17 = int_to_ptr.vmem [resolvable:$true] %s59_s17 }
  0x36   :  { %p4014_p11 = scmp.lt.u32.totalorder %s4010_s21, %s4223_s5 }
  0x38   :  { %p4016_p12 = pnand %p4014_p11, %p4011_p10 }
  0x3a   :  { %4019 = shalt.err (!%p4016_p12)
}
  0x3b   :  { %s4020_s1 = scalar_lea.vmem %s60_s17, 4096  ;;  %p4025_p0 = scmp.lt.s32.totalorder %s60_s17, %s60_s17 }
  0x3c   :  { %p4021_p13 = scmp.ne.s32.totalorder %s60_s17, %s4020_s1  ;;  %p4026_p1 = scmp.lt.s32.totalorder %s4020_s1, %s4020_s1 }
  0x3e   :  { %p4027_p2 = por %p4026_p1, %p4025_p0 }
  0x40   :  { %p4028_p3 = pnand %p4027_p2, %p4021_p13 }
  0x42   :  { %4031 = shalt.err (!%p4028_p3)
}
  0x43   :  { %s4068_s3 = smov 64   ;;  %s4069_s11 = smov 4  }
  0x44   :  { %65 = dma.hbm_to_vmem [thread:$0]  %s4223_s5, 4096, %s60_s17, [#allocation9], %s4068_s3, %s4068_s3, %s4069_s11  }
  0x45   :  { %4054 = dma.done.wait [#allocation3], 896  }
  0x46   :  { %4055 = vsyncadd [#allocation3], 4294966400 }
  0x47   :  { %4056 = dma.done.wait [#allocation6], 41472  }
  0x48   :  { %4057 = vsyncadd [#allocation6], 4294925824 }
  0x49   :  { %4058 = dma.done.wait [#allocation9], 4096  }
  0x4a   :  { %4059 = vsyncadd [#allocation9], 4294963200  ;;  %v3422_v0 = vld [vmem:[#allocation5 + $0x4] ss:$16 sps:$4 sm:$0xff]   ;;  %v3424_v1 = vld [vmem:[#allocation5 + $0xc] ss:$16 sps:$4 sm:$0xff]  }
  0x4b   :  { %1300 = vmatprep.subr.bf16.mxu0 %v3422_v0  ;;  %v3426_v2 = vld [vmem:[#allocation5] ss:$16 sps:$4 sm:$0xff]   ;;  %v3427_v3 = vld [vmem:[#allocation5 + $0x8] ss:$16 sps:$4 sm:$0xff]   ;;  %1464 = vmatprep.subr.bf16.mxu1 %v3424_v1  ;;  %v3428_v4 = vld [vmem:[#allocation5 + $0x24] ss:$16 sps:$4 sm:$0xff]  }
  0x4c   :  { %1301 = vmatpush1.bf16.msra.mxu0 %v3426_v2  ;;  %1465 = vmatpush1.bf16.msra.mxu1 %v3427_v3  ;;  %v3430_v5 = vld [vmem:[#allocation5 + $0x2c] ss:$16 sps:$4 sm:$0xff]   ;;  %v3432_v6 = vld [vmem:[#allocation5 + $0x20] ss:$16 sps:$4 sm:$0xff]   ;;  %v3433_v7 = vld [vmem:[#allocation5 + $0x28] ss:$16 sps:$4 sm:$0xff]  }
  0x4d   :  { %1302 = vmatprep.subr.bf16.mxu0 %v3428_v4  ;;  %1466 = vmatprep.subr.bf16.mxu1 %v3430_v5  ;;  %v3434_v8 = vld [vmem:[#allocation5 + $0x44] ss:$16 sps:$4 sm:$0xff]   ;;  %v3436_v9 = vld [vmem:[#allocation5 + $0x4c] ss:$16 sps:$4 sm:$0xff]   ;;  %v3438_v10 = vld [vmem:[#allocation5 + $0x40] ss:$16 sps:$4 sm:$0xff]  }
  0x4e   :  { %v3439_v11 = vld [vmem:[#allocation5 + $0x48] ss:$16 sps:$4 sm:$0xff]   ;;  %v3440_v12 = vld [vmem:[#allocation5 + $0x64] ss:$16 sps:$4 sm:$0xff]   ;;  %v3442_v13 = vld [vmem:[#allocation5 + $0x6c] ss:$16 sps:$4 sm:$0xff]  }
  0x4f   :  { %v3444_v14 = vld [vmem:[#allocation5 + $0x60] ss:$16 sps:$4 sm:$0xff]   ;;  %v3445_v15 = vld [vmem:[#allocation5 + $0x68] ss:$16 sps:$4 sm:$0xff]   ;;  %v3446_v16 = vld [vmem:[#allocation5 + $0x84] ss:$16 sps:$4 sm:$0xff]  }
  0x50   :  { %1303 = vmatpush1.bf16.msra.mxu0 %v3432_v6  ;;  %1467 = vmatpush1.bf16.msra.mxu1 %v3433_v7  ;;  %v3448_v17 = vld [vmem:[#allocation5 + $0x8c] ss:$16 sps:$4 sm:$0xff]   ;;  %v3450_v18 = vld [vmem:[#allocation5 + $0x80] ss:$16 sps:$4 sm:$0xff]   ;;  %v3451_v19 = vld [vmem:[#allocation5 + $0x88] ss:$16 sps:$4 sm:$0xff]  }
  0x51   :  { %1304 = vmatprep.subr.bf16.mxu0 %v3434_v8  ;;  %1468 = vmatprep.subr.bf16.mxu1 %v3436_v9  ;;  %v3452_v20 = vld [vmem:[#allocation5 + $0xa4] ss:$16 sps:$4 sm:$0xff]   ;;  %v3454_v21 = vld [vmem:[#allocation5 + $0xac] ss:$16 sps:$4 sm:$0xff]   ;;  %v3456_v22 = vld [vmem:[#allocation5 + $0xa0] ss:$16 sps:$4 sm:$0xff]  }
  0x52   :  { %v3457_v23 = vld [vmem:[#allocation5 + $0xa8] ss:$16 sps:$4 sm:$0xff]   ;;  %v3458_v24 = vld [vmem:[#allocation5 + $0xc4] ss:$16 sps:$4 sm:$0xff]   ;;  %v3460_v25 = vld [vmem:[#allocation5 + $0xcc] ss:$16 sps:$4 sm:$0xff]  }
  0x53   :  { %v3462_v26 = vld [vmem:[#allocation5 + $0xc0] ss:$16 sps:$4 sm:$0xff]   ;;  %v3463_v27 = vld [vmem:[#allocation5 + $0xc8] ss:$16 sps:$4 sm:$0xff]   ;;  %v3464_v28 = vld [vmem:[#allocation5 + $0xe4] ss:$16 sps:$4 sm:$0xff]  }
  0x54   :  { %1305 = vmatpush1.bf16.msra.mxu0 %v3438_v10  ;;  %1469 = vmatpush1.bf16.msra.mxu1 %v3439_v11  ;;  %v3466_v29 = vld [vmem:[#allocation5 + $0xec] ss:$16 sps:$4 sm:$0xff]   ;;  %v3468_v30 = vld [vmem:[#allocation5 + $0xe0] ss:$16 sps:$4 sm:$0xff]   ;;  %v3469_v31 = vld [vmem:[#allocation5 + $0xe8] ss:$16 sps:$4 sm:$0xff]  }
  0x55   :  { %1306 = vmatprep.subr.bf16.mxu0 %v3440_v12  ;;  %1470 = vmatprep.subr.bf16.mxu1 %v3442_v13  ;;  %v3470_v32 = vld [vmem:[#allocation5 + $0x104] ss:$16 sps:$4 sm:$0xff]   ;;  %v3472_v33 = vld [vmem:[#allocation5 + $0x10c] ss:$16 sps:$4 sm:$0xff]   ;;  %v3474_v34 = vld [vmem:[#allocation5 + $0x100] ss:$16 sps:$4 sm:$0xff]  }
  0x56   :  { %v3475_v35 = vld [vmem:[#allocation5 + $0x108] ss:$16 sps:$4 sm:$0xff]   ;;  %v3476_v36 = vld [vmem:[#allocation5 + $0x124] ss:$16 sps:$4 sm:$0xff]   ;;  %v3478_v37 = vld [vmem:[#allocation5 + $0x12c] ss:$16 sps:$4 sm:$0xff]  }
  0x57   :  { %v3480_v38 = vld [vmem:[#allocation5 + $0x120] ss:$16 sps:$4 sm:$0xff]   ;;  %v3481_v39 = vld [vmem:[#allocation5 + $0x128] ss:$16 sps:$4 sm:$0xff]   ;;  %v3482_v40 = vld [vmem:[#allocation5 + $0x144] ss:$16 sps:$4 sm:$0xff]  }
  0x58   :  { %1307 = vmatpush1.bf16.msra.mxu0 %v3444_v14  ;;  %1471 = vmatpush1.bf16.msra.mxu1 %v3445_v15  ;;  %v3484_v41 = vld [vmem:[#allocation5 + $0x14c] ss:$16 sps:$4 sm:$0xff]   ;;  %v3486_v42 = vld [vmem:[#allocation5 + $0x140] ss:$16 sps:$4 sm:$0xff]   ;;  %v3487_v43 = vld [vmem:[#allocation5 + $0x148] ss:$16 sps:$4 sm:$0xff]  }
  0x59   :  { %1308 = vmatprep.subr.bf16.mxu0 %v3446_v16  ;;  %1472 = vmatprep.subr.bf16.mxu1 %v3448_v17  ;;  %v3488_v44 = vld [vmem:[#allocation5 + $0x164] ss:$16 sps:$4 sm:$0xff]   ;;  %v3490_v45 = vld [vmem:[#allocation5 + $0x16c] ss:$16 sps:$4 sm:$0xff]   ;;  %v3492_v47 = vld [vmem:[#allocation5 + $0x160] ss:$16 sps:$4 sm:$0xff]  }
  0x5a   :  { %v85_v46 = vld [vmem:[#allocation2 + $0x8] sm:$0xff]  ;;  %v3493_v49 = vld [vmem:[#allocation5 + $0x168] ss:$16 sps:$4 sm:$0xff]   ;;  %v3496_v51 = vld [vmem:[#allocation5 + $0x18c] ss:$16 sps:$4 sm:$0xff]   ;;  %vm1296_vm0 = vcmask 130048  }
  0x5b   :  { %v92_v48 = vpack.c.bf16 %v85_v46, %v85_v46  ;;  %v3494_v50 = vld [vmem:[#allocation5 + $0x184] ss:$16 sps:$4 sm:$0xff]   ;;  %v3498_v52 = vld [vmem:[#allocation5 + $0x180] ss:$16 sps:$4 sm:$0xff]   ;;  %v3499_v53 = vld [vmem:[#allocation5 + $0x188] ss:$16 sps:$4 sm:$0xff]  }
  0x5c   :  { %1309 = vmatpush1.bf16.msra.mxu0 %v3450_v18  ;;  %1473 = vmatpush1.bf16.msra.mxu1 %v3451_v19  ;;  %v3500_v54 = vld [vmem:[#allocation5 + $0x1a4] ss:$16 sps:$4 sm:$0xff]   ;;  %v3502_v55 = vld [vmem:[#allocation5 + $0x1ac] ss:$16 sps:$4 sm:$0xff]   ;;  %v3504_v56 = vld [vmem:[#allocation5 + $0x1a0] ss:$16 sps:$4 sm:$0xff]  }
  0x5d   :  { %1310 = vmatprep.subr.bf16.mxu0 %v3452_v20  ;;  %1474 = vmatprep.subr.bf16.mxu1 %v3454_v21  ;;  %v3505_v57 = vld [vmem:[#allocation5 + $0x1a8] ss:$16 sps:$4 sm:$0xff]   ;;  %v3506_v58 = vld [vmem:[#allocation5 + $0x1c4] ss:$16 sps:$4 sm:$0xff]   ;;  %v3508_v59 = vld [vmem:[#allocation5 + $0x1cc] ss:$16 sps:$4 sm:$0xff]  }
  0x5e   :  { %1332 = vmatprep.mubr.bf16.mxu0 %v92_v48  ;;  %1496 = vmatprep.mubr.bf16.mxu1 %v92_v48  ;;  %v3510_v60 = vld [vmem:[#allocation5 + $0x1c0] ss:$16 sps:$4 sm:$0xff]   ;;  %v3511_v61 = vld [vmem:[#allocation5 + $0x1c8] ss:$16 sps:$4 sm:$0xff]   ;;  %v3512_v62 = vld [vmem:[#allocation5 + $0x1e4] ss:$16 sps:$4 sm:$0xff]  }
  0x5f   :  { %v3514_v63 = vld [vmem:[#allocation5 + $0x1ec] ss:$16 sps:$4 sm:$0xff]   ;;  %v3516_v0 = vld [vmem:[#allocation5 + $0x1e0] ss:$16 sps:$4 sm:$0xff]   ;;  %v3517_v1 = vld [vmem:[#allocation5 + $0x1e8] ss:$16 sps:$4 sm:$0xff]  }
  0x60   :  { %1311 = vmatpush1.bf16.msra.mxu0 %v3456_v22  ;;  %1475 = vmatpush1.bf16.msra.mxu1 %v3457_v23  ;;  %v84_v2 = vld [vmem:[#allocation2] sm:$0xff]  ;;  %v3520_v3 = vld [vmem:[#allocation5 + $0x204] ss:$16 sps:$4 sm:$0xff]   ;;  %v3518_v6 = vld [vmem:[#allocation5 + $0x200] ss:$16 sps:$4 sm:$0xff]  }
  0x61   :  { %1312 = vmatprep.subr.bf16.mxu0 %v3458_v24  ;;  %1476 = vmatprep.subr.bf16.mxu1 %v3460_v25  ;;  %v3523_v4 = vld [vmem:[#allocation5 + $0x20c] ss:$16 sps:$4 sm:$0xff]   ;;  %v91_v5 = vpack.c.bf16 %v84_v2, %v84_v2  ;;  %v3521_v7 = vld [vmem:[#allocation5 + $0x208] ss:$16 sps:$4 sm:$0xff]   ;;  %v3526_v8 = vld [vmem:[#allocation5 + $0x224] ss:$16 sps:$4 sm:$0xff]  }
  0x62   :  { %v3529_v9 = vld [vmem:[#allocation5 + $0x22c] ss:$16 sps:$4 sm:$0xff]   ;;  %v3524_v10 = vld [vmem:[#allocation5 + $0x220] ss:$16 sps:$4 sm:$0xff]   ;;  %v3527_v11 = vld [vmem:[#allocation5 + $0x228] ss:$16 sps:$4 sm:$0xff]  }
  0x63   :  { %v3532_v12 = vld [vmem:[#allocation5 + $0x244] ss:$16 sps:$4 sm:$0xff]   ;;  %v3535_v13 = vld [vmem:[#allocation5 + $0x24c] ss:$16 sps:$4 sm:$0xff]   ;;  %v3530_v14 = vld [vmem:[#allocation5 + $0x240] ss:$16 sps:$4 sm:$0xff]  }
  0x64   :  { %1313 = vmatpush1.bf16.msra.mxu0 %v3462_v26  ;;  %1477 = vmatpush1.bf16.msra.mxu1 %v3463_v27  ;;  %v3533_v15 = vld [vmem:[#allocation5 + $0x248] ss:$16 sps:$4 sm:$0xff]   ;;  %v3538_v16 = vld [vmem:[#allocation5 + $0x264] ss:$16 sps:$4 sm:$0xff]   ;;  %v3541_v17 = vld [vmem:[#allocation5 + $0x26c] ss:$16 sps:$4 sm:$0xff]  }
  0x65   :  { %1314 = vmatprep.subr.bf16.mxu0 %v3464_v28  ;;  %1478 = vmatprep.subr.bf16.mxu1 %v3466_v29  ;;  %v3536_v18 = vld [vmem:[#allocation5 + $0x260] ss:$16 sps:$4 sm:$0xff]   ;;  %v3539_v19 = vld [vmem:[#allocation5 + $0x268] ss:$16 sps:$4 sm:$0xff]   ;;  %v3544_v20 = vld [vmem:[#allocation5 + $0x284] ss:$16 sps:$4 sm:$0xff]  }
  0x66   :  { %v3547_v21 = vld [vmem:[#allocation5 + $0x28c] ss:$16 sps:$4 sm:$0xff]   ;;  %v3542_v22 = vld [vmem:[#allocation5 + $0x280] ss:$16 sps:$4 sm:$0xff]   ;;  %v3545_v23 = vld [vmem:[#allocation5 + $0x288] ss:$16 sps:$4 sm:$0xff]  }
  0x67   :  { %v3550_v24 = vld [vmem:[#allocation5 + $0x2a4] ss:$16 sps:$4 sm:$0xff]   ;;  %v3553_v25 = vld [vmem:[#allocation5 + $0x2ac] ss:$16 sps:$4 sm:$0xff]   ;;  %v3548_v26 = vld [vmem:[#allocation5 + $0x2a0] ss:$16 sps:$4 sm:$0xff]  }
  0x68   :  { %1315 = vmatpush1.bf16.msra.mxu0 %v3468_v30  ;;  %1479 = vmatpush1.bf16.msra.mxu1 %v3469_v31  ;;  %v3551_v27 = vld [vmem:[#allocation5 + $0x2a8] ss:$16 sps:$4 sm:$0xff]   ;;  %v3556_v28 = vld [vmem:[#allocation5 + $0x2c4] ss:$16 sps:$4 sm:$0xff]   ;;  %v3559_v29 = vld [vmem:[#allocation5 + $0x2cc] ss:$16 sps:$4 sm:$0xff]  }
  0x69   :  { %1316 = vmatprep.subr.bf16.mxu0 %v3470_v32  ;;  %1480 = vmatprep.subr.bf16.mxu1 %v3472_v33  ;;  %v87_v30 = vld [vmem:[#allocation2 + $0x18] sm:$0xff]  ;;  %v3557_v33 = vld [vmem:[#allocation5 + $0x2c8] ss:$16 sps:$4 sm:$0xff]  }
  0x6a   :  { %v3554_v31 = vld [vmem:[#allocation5 + $0x2c0] ss:$16 sps:$4 sm:$0xff]   ;;  %v94_v32 = vpack.c.bf16 %v87_v30, %v87_v30  ;;  %v3580_v46 = vld [vmem:[#allocation5 + $0x344] ss:$16 sps:$4 sm:$0xff]  }
  0x6b   :  { %v3578_v48 = vld [vmem:[#allocation5 + $0x340] ss:$16 sps:$4 sm:$0xff]   ;;  %v3610_v2 = vld [vmem:[#allocation5 + $0x3e4] ss:$16 sps:$4 sm:$0xff]  }
  0x6c   :  { %1317 = vmatpush1.bf16.msra.mxu0 %v3474_v34  ;;  %1481 = vmatpush1.bf16.msra.mxu1 %v3475_v35  ;;  %v3562_v34 = vld [vmem:[#allocation5 + $0x2e4] ss:$16 sps:$4 sm:$0xff]   ;;  %v3565_v35 = vld [vmem:[#allocation5 + $0x2ec] ss:$16 sps:$4 sm:$0xff]  }
  0x6d   :  { %1318 = vmatprep.subr.bf16.mxu0 %v3476_v36  ;;  %1482 = vmatprep.subr.bf16.mxu1 %v3478_v37  ;;  %v3560_v36 = vld [vmem:[#allocation5 + $0x2e0] ss:$16 sps:$4 sm:$0xff]   ;;  %v3563_v37 = vld [vmem:[#allocation5 + $0x2e8] ss:$16 sps:$4 sm:$0xff]   ;;  %v3646_v30 = vld [vmem:[#allocation5 + $0x4a4] ss:$16 sps:$4 sm:$0xff]  }
  0x70   :  { %1319 = vmatpush1.bf16.msra.mxu0 %v3480_v38  ;;  %1483 = vmatpush1.bf16.msra.mxu1 %v3481_v39  ;;  %v3568_v38 = vld [vmem:[#allocation5 + $0x304] ss:$16 sps:$4 sm:$0xff]   ;;  %v3571_v39 = vld [vmem:[#allocation5 + $0x30c] ss:$16 sps:$4 sm:$0xff]  }
  0x71   :  { %1320 = vmatprep.subr.bf16.mxu0 %v3482_v40  ;;  %1484 = vmatprep.subr.bf16.mxu1 %v3484_v41  ;;  %v3566_v40 = vld [vmem:[#allocation5 + $0x300] ss:$16 sps:$4 sm:$0xff]   ;;  %v3569_v41 = vld [vmem:[#allocation5 + $0x308] ss:$16 sps:$4 sm:$0xff]  }
  0x74   :  { %1321 = vmatpush1.bf16.msra.mxu0 %v3486_v42  ;;  %1485 = vmatpush1.bf16.msra.mxu1 %v3487_v43  ;;  %v3574_v42 = vld [vmem:[#allocation5 + $0x324] ss:$16 sps:$4 sm:$0xff]   ;;  %v3577_v43 = vld [vmem:[#allocation5 + $0x32c] ss:$16 sps:$4 sm:$0xff]  }
  0x75   :  { %1322 = vmatprep.subr.bf16.mxu0 %v3488_v44  ;;  %1486 = vmatprep.subr.bf16.mxu1 %v3490_v45  ;;  %v3572_v44 = vld [vmem:[#allocation5 + $0x320] ss:$16 sps:$4 sm:$0xff]   ;;  %v3575_v45 = vld [vmem:[#allocation5 + $0x328] ss:$16 sps:$4 sm:$0xff]  }
  0x78   :  { %1323 = vmatpush1.bf16.msra.mxu0 %v3492_v47  ;;  %1487 = vmatpush1.bf16.msra.mxu1 %v3493_v49  ;;  %v3583_v47 = vld [vmem:[#allocation5 + $0x34c] ss:$16 sps:$4 sm:$0xff]   ;;  %v3581_v49 = vld [vmem:[#allocation5 + $0x348] ss:$16 sps:$4 sm:$0xff]  }
  0x79   :  { %1324 = vmatprep.subr.bf16.mxu0 %v3494_v50  ;;  %1488 = vmatprep.subr.bf16.mxu1 %v3496_v51  ;;  %v3586_v50 = vld [vmem:[#allocation5 + $0x364] ss:$16 sps:$4 sm:$0xff]   ;;  %v3589_v51 = vld [vmem:[#allocation5 + $0x36c] ss:$16 sps:$4 sm:$0xff]  }
  0x7c   :  { %1325 = vmatpush1.bf16.msra.mxu0 %v3498_v52  ;;  %1489 = vmatpush1.bf16.msra.mxu1 %v3499_v53  ;;  %v3584_v52 = vld [vmem:[#allocation5 + $0x360] ss:$16 sps:$4 sm:$0xff]   ;;  %v3587_v53 = vld [vmem:[#allocation5 + $0x368] ss:$16 sps:$4 sm:$0xff]  }
  0x7d   :  { %1326 = vmatprep.subr.bf16.mxu0 %v3500_v54  ;;  %1490 = vmatprep.subr.bf16.mxu1 %v3502_v55  ;;  %v3592_v54 = vld [vmem:[#allocation5 + $0x384] ss:$16 sps:$4 sm:$0xff]   ;;  %v3595_v55 = vld [vmem:[#allocation5 + $0x38c] ss:$16 sps:$4 sm:$0xff]  }
  0x80   :  { %1327 = vmatpush1.bf16.msra.mxu0 %v3504_v56  ;;  %1491 = vmatpush1.bf16.msra.mxu1 %v3505_v57  ;;  %v3590_v56 = vld [vmem:[#allocation5 + $0x380] ss:$16 sps:$4 sm:$0xff]   ;;  %v3593_v57 = vld [vmem:[#allocation5 + $0x388] ss:$16 sps:$4 sm:$0xff]  }
  0x81   :  { %1328 = vmatprep.subr.bf16.mxu0 %v3506_v58  ;;  %1492 = vmatprep.subr.bf16.mxu1 %v3508_v59  ;;  %v3598_v58 = vld [vmem:[#allocation5 + $0x3a4] ss:$16 sps:$4 sm:$0xff]   ;;  %v3601_v59 = vld [vmem:[#allocation5 + $0x3ac] ss:$16 sps:$4 sm:$0xff]  }
  0x84   :  { %1329 = vmatpush1.bf16.msra.mxu0 %v3510_v60  ;;  %1493 = vmatpush1.bf16.msra.mxu1 %v3511_v61  ;;  %v3596_v60 = vld [vmem:[#allocation5 + $0x3a0] ss:$16 sps:$4 sm:$0xff]   ;;  %v3599_v61 = vld [vmem:[#allocation5 + $0x3a8] ss:$16 sps:$4 sm:$0xff]  }
  0x85   :  { %1330 = vmatprep.subr.bf16.mxu0 %v3512_v62  ;;  %1494 = vmatprep.subr.bf16.mxu1 %v3514_v63  ;;  %v3604_v62 = vld [vmem:[#allocation5 + $0x3c4] ss:$16 sps:$4 sm:$0xff]   ;;  %v3607_v63 = vld [vmem:[#allocation5 + $0x3cc] ss:$16 sps:$4 sm:$0xff]  }
  0x88   :  { %1331 = vmatpush1.bf16.msra.mxu0 %v3516_v0  ;;  %1495 = vmatpush1.bf16.msra.mxu1 %v3517_v1  ;;  %v3602_v0 = vld [vmem:[#allocation5 + $0x3c0] ss:$16 sps:$4 sm:$0xff]   ;;  %v3605_v1 = vld [vmem:[#allocation5 + $0x3c8] ss:$16 sps:$4 sm:$0xff]  }
  0x89   :  { %1341 = vmatprep.subr.bf16.mxu0 %v3520_v3  ;;  %1505 = vmatprep.subr.bf16.mxu1 %v3523_v4  ;;  %v3613_v3 = vld [vmem:[#allocation5 + $0x3ec] ss:$16 sps:$4 sm:$0xff]   ;;  %v3608_v4 = vld [vmem:[#allocation5 + $0x3e0] ss:$16 sps:$4 sm:$0xff]  }
  0x8b   :  { %1333 = vmatmul.mubr.bf16.vlgmr.msra.gmra.mrb[0].mxu0 %v91_v5  ;;  %1497 = vmatmul.mubr.bf16.vlgmr.msra.gmra.mrb[0].mxu1 %v91_v5  ;;  %v3611_v5 = vld [vmem:[#allocation5 + $0x3e8] ss:$16 sps:$4 sm:$0xff]  }
  0x8c   :  { %1342 = vmatpush1.bf16.msra.mxu0 %v3518_v6  ;;  %1506 = vmatpush1.bf16.msra.mxu1 %v3521_v7  ;;  %v3616_v6 = vld [vmem:[#allocation5 + $0x404] ss:$16 sps:$4 sm:$0xff]   ;;  %v86_v7 = vld [vmem:[#allocation2 + $0x10] sm:$0xff] }
  0x8d   :  { %1343 = vmatprep.subr.bf16.mxu0 %v3526_v8  ;;  %1507 = vmatprep.subr.bf16.mxu1 %v3529_v9  ;;  %v3619_v8 = vld [vmem:[#allocation5 + $0x40c] ss:$16 sps:$4 sm:$0xff]   ;;  %v3614_v9 = vld [vmem:[#allocation5 + $0x400] ss:$16 sps:$4 sm:$0xff]  }
  0x8e   :  { %1373 = vmatprep.mubr.bf16.mxu0 %v94_v32  ;;  %1537 = vmatprep.mubr.bf16.mxu1 %v94_v32  ;;  %v3644_v32 = vld [vmem:[#allocation5 + $0x4a0] ss:$16 sps:$4 sm:$0xff]  }
  0x90   :  { %1344 = vmatpush1.bf16.msra.mxu0 %v3524_v10  ;;  %1508 = vmatpush1.bf16.msra.mxu1 %v3527_v11  ;;  %v93_v10 = vpack.c.bf16 %v86_v7, %v86_v7  ;;  %v3617_v11 = vld [vmem:[#allocation5 + $0x408] ss:$16 sps:$4 sm:$0xff]   ;;  %v3709_v7 = vld [vmem:[#allocation5 + $0x5ec] ss:$16 sps:$4 sm:$0xff]  }
  0x91   :  { %1345 = vmatprep.subr.bf16.mxu0 %v3532_v12  ;;  %1509 = vmatprep.subr.bf16.mxu1 %v3535_v13  ;;  %v3622_v12 = vld [vmem:[#allocation5 + $0x424] ss:$16 sps:$4 sm:$0xff]   ;;  %v3625_v13 = vld [vmem:[#allocation5 + $0x42c] ss:$16 sps:$4 sm:$0xff]  }
  0x94   :  { %1346 = vmatpush1.bf16.msra.mxu0 %v3530_v14  ;;  %1510 = vmatpush1.bf16.msra.mxu1 %v3533_v15  ;;  %v89_v14 = vld [vmem:[#allocation2 + $0x28] sm:$0xff] }
  0x95   :  { %1347 = vmatprep.subr.bf16.mxu0 %v3538_v16  ;;  %1511 = vmatprep.subr.bf16.mxu1 %v3541_v17  ;;  %v96_v15 = vpack.c.bf16 %v89_v14, %v89_v14  ;;  %v3620_v16 = vld [vmem:[#allocation5 + $0x420] ss:$16 sps:$4 sm:$0xff]   ;;  %v3623_v17 = vld [vmem:[#allocation5 + $0x428] ss:$16 sps:$4 sm:$0xff]  }
  0x96   :  { %v3713_v14 = vld [vmem:[#allocation5 + $0x608] ss:$16 sps:$4 sm:$0xff]  }
  0x98   :  { %1348 = vmatpush1.bf16.msra.mxu0 %v3536_v18  ;;  %1512 = vmatpush1.bf16.msra.mxu1 %v3539_v19  ;;  %v3628_v18 = vld [vmem:[#allocation5 + $0x444] ss:$16 sps:$4 sm:$0xff]   ;;  %v3631_v19 = vld [vmem:[#allocation5 + $0x44c] ss:$16 sps:$4 sm:$0xff]  }
  0x99   :  { %1349 = vmatprep.subr.bf16.mxu0 %v3544_v20  ;;  %1513 = vmatprep.subr.bf16.mxu1 %v3547_v21  ;;  %v3626_v20 = vld [vmem:[#allocation5 + $0x440] ss:$16 sps:$4 sm:$0xff]   ;;  %v3629_v21 = vld [vmem:[#allocation5 + $0x448] ss:$16 sps:$4 sm:$0xff]  }
  0x9c   :  { %1350 = vmatpush1.bf16.msra.mxu0 %v3542_v22  ;;  %1514 = vmatpush1.bf16.msra.mxu1 %v3545_v23  ;;  %v3634_v22 = vld [vmem:[#allocation5 + $0x464] ss:$16 sps:$4 sm:$0xff]   ;;  %v3637_v23 = vld [vmem:[#allocation5 + $0x46c] ss:$16 sps:$4 sm:$0xff]  }
  0x9d   :  { %1351 = vmatprep.subr.bf16.mxu0 %v3550_v24  ;;  %1515 = vmatprep.subr.bf16.mxu1 %v3553_v25  ;;  %v3632_v24 = vld [vmem:[#allocation5 + $0x460] ss:$16 sps:$4 sm:$0xff]   ;;  %v3635_v25 = vld [vmem:[#allocation5 + $0x468] ss:$16 sps:$4 sm:$0xff]  }
  0xa0   :  { %1352 = vmatpush1.bf16.msra.mxu0 %v3548_v26  ;;  %1516 = vmatpush1.bf16.msra.mxu1 %v3551_v27  ;;  %v3640_v26 = vld [vmem:[#allocation5 + $0x484] ss:$16 sps:$4 sm:$0xff]   ;;  %v3643_v27 = vld [vmem:[#allocation5 + $0x48c] ss:$16 sps:$4 sm:$0xff]  }
  0xa1   :  { %1353 = vmatprep.subr.bf16.mxu0 %v3556_v28  ;;  %1517 = vmatprep.subr.bf16.mxu1 %v3559_v29  ;;  %v3638_v28 = vld [vmem:[#allocation5 + $0x480] ss:$16 sps:$4 sm:$0xff]   ;;  %v3641_v29 = vld [vmem:[#allocation5 + $0x488] ss:$16 sps:$4 sm:$0xff]  }
  0xa4   :  { %1354 = vmatpush1.bf16.msra.mxu0 %v3554_v31  ;;  %1518 = vmatpush1.bf16.msra.mxu1 %v3557_v33  ;;  %v3649_v31 = vld [vmem:[#allocation5 + $0x4ac] ss:$16 sps:$4 sm:$0xff]   ;;  %v3647_v33 = vld [vmem:[#allocation5 + $0x4a8] ss:$16 sps:$4 sm:$0xff]  }
  0xa5   :  { %1355 = vmatprep.subr.bf16.mxu0 %v3562_v34  ;;  %1519 = vmatprep.subr.bf16.mxu1 %v3565_v35  ;;  %v3652_v34 = vld [vmem:[#allocation5 + $0x4c4] ss:$16 sps:$4 sm:$0xff]   ;;  %v3655_v35 = vld [vmem:[#allocation5 + $0x4cc] ss:$16 sps:$4 sm:$0xff]  }
  0xa8   :  { %1356 = vmatpush1.bf16.msra.mxu0 %v3560_v36  ;;  %1520 = vmatpush1.bf16.msra.mxu1 %v3563_v37  ;;  %v3650_v36 = vld [vmem:[#allocation5 + $0x4c0] ss:$16 sps:$4 sm:$0xff]   ;;  %v3653_v37 = vld [vmem:[#allocation5 + $0x4c8] ss:$16 sps:$4 sm:$0xff]  }
  0xa9   :  { %1357 = vmatprep.subr.bf16.mxu0 %v3568_v38  ;;  %1521 = vmatprep.subr.bf16.mxu1 %v3571_v39  ;;  %v3658_v38 = vld [vmem:[#allocation5 + $0x4e4] ss:$16 sps:$4 sm:$0xff]   ;;  %v3661_v39 = vld [vmem:[#allocation5 + $0x4ec] ss:$16 sps:$4 sm:$0xff]  }
  0xac   :  { %1358 = vmatpush1.bf16.msra.mxu0 %v3566_v40  ;;  %1522 = vmatpush1.bf16.msra.mxu1 %v3569_v41  ;;  %v3656_v40 = vld [vmem:[#allocation5 + $0x4e0] ss:$16 sps:$4 sm:$0xff]   ;;  %v3659_v41 = vld [vmem:[#allocation5 + $0x4e8] ss:$16 sps:$4 sm:$0xff]  }
  0xad   :  { %1359 = vmatprep.subr.bf16.mxu0 %v3574_v42  ;;  %1523 = vmatprep.subr.bf16.mxu1 %v3577_v43  ;;  %v3664_v42 = vld [vmem:[#allocation5 + $0x504] ss:$16 sps:$4 sm:$0xff]   ;;  %v3667_v43 = vld [vmem:[#allocation5 + $0x50c] ss:$16 sps:$4 sm:$0xff]  }
  0xb0   :  { %1360 = vmatpush1.bf16.msra.mxu0 %v3572_v44  ;;  %1524 = vmatpush1.bf16.msra.mxu1 %v3575_v45  ;;  %v3662_v44 = vld [vmem:[#allocation5 + $0x500] ss:$16 sps:$4 sm:$0xff]   ;;  %v3665_v45 = vld [vmem:[#allocation5 + $0x508] ss:$16 sps:$4 sm:$0xff]  }
  0xb1   :  { %1361 = vmatprep.subr.bf16.mxu0 %v3580_v46  ;;  %1525 = vmatprep.subr.bf16.mxu1 %v3583_v47  ;;  %v3670_v46 = vld [vmem:[#allocation5 + $0x524] ss:$16 sps:$4 sm:$0xff]   ;;  %v3673_v47 = vld [vmem:[#allocation5 + $0x52c] ss:$16 sps:$4 sm:$0xff]  }
  0xb4   :  { %1362 = vmatpush1.bf16.msra.mxu0 %v3578_v48  ;;  %1526 = vmatpush1.bf16.msra.mxu1 %v3581_v49  ;;  %v3668_v48 = vld [vmem:[#allocation5 + $0x520] ss:$16 sps:$4 sm:$0xff]   ;;  %v3671_v49 = vld [vmem:[#allocation5 + $0x528] ss:$16 sps:$4 sm:$0xff]  }
  0xb5   :  { %1363 = vmatprep.subr.bf16.mxu0 %v3586_v50  ;;  %1527 = vmatprep.subr.bf16.mxu1 %v3589_v51  ;;  %v3676_v50 = vld [vmem:[#allocation5 + $0x544] ss:$16 sps:$4 sm:$0xff]   ;;  %v3679_v51 = vld [vmem:[#allocation5 + $0x54c] ss:$16 sps:$4 sm:$0xff]  }
  0xb8   :  { %1364 = vmatpush1.bf16.msra.mxu0 %v3584_v52  ;;  %1528 = vmatpush1.bf16.msra.mxu1 %v3587_v53  ;;  %v3674_v52 = vld [vmem:[#allocation5 + $0x540] ss:$16 sps:$4 sm:$0xff]   ;;  %v3677_v53 = vld [vmem:[#allocation5 + $0x548] ss:$16 sps:$4 sm:$0xff]  }
  0xb9   :  { %1365 = vmatprep.subr.bf16.mxu0 %v3592_v54  ;;  %1529 = vmatprep.subr.bf16.mxu1 %v3595_v55  ;;  %v3682_v54 = vld [vmem:[#allocation5 + $0x564] ss:$16 sps:$4 sm:$0xff]   ;;  %v3685_v55 = vld [vmem:[#allocation5 + $0x56c] ss:$16 sps:$4 sm:$0xff]  }
  0xbc   :  { %1366 = vmatpush1.bf16.msra.mxu0 %v3590_v56  ;;  %1530 = vmatpush1.bf16.msra.mxu1 %v3593_v57  ;;  %v3680_v56 = vld [vmem:[#allocation5 + $0x560] ss:$16 sps:$4 sm:$0xff]   ;;  %v3683_v57 = vld [vmem:[#allocation5 + $0x568] ss:$16 sps:$4 sm:$0xff]  }
  0xbd   :  { %1367 = vmatprep.subr.bf16.mxu0 %v3598_v58  ;;  %1531 = vmatprep.subr.bf16.mxu1 %v3601_v59  ;;  %v3688_v58 = vld [vmem:[#allocation5 + $0x584] ss:$16 sps:$4 sm:$0xff]   ;;  %v3691_v59 = vld [vmem:[#allocation5 + $0x58c] ss:$16 sps:$4 sm:$0xff]  }
  0xc0   :  { %1368 = vmatpush1.bf16.msra.mxu0 %v3596_v60  ;;  %1532 = vmatpush1.bf16.msra.mxu1 %v3599_v61  ;;  %v3686_v60 = vld [vmem:[#allocation5 + $0x580] ss:$16 sps:$4 sm:$0xff]   ;;  %v3689_v61 = vld [vmem:[#allocation5 + $0x588] ss:$16 sps:$4 sm:$0xff]  }
  0xc1   :  { %1369 = vmatprep.subr.bf16.mxu0 %v3604_v62  ;;  %1533 = vmatprep.subr.bf16.mxu1 %v3607_v63  ;;  %v3694_v62 = vld [vmem:[#allocation5 + $0x5a4] ss:$16 sps:$4 sm:$0xff]   ;;  %v3697_v63 = vld [vmem:[#allocation5 + $0x5ac] ss:$16 sps:$4 sm:$0xff]  }
  0xc4   :  { %1370 = vmatpush1.bf16.msra.mxu0 %v3602_v0  ;;  %1534 = vmatpush1.bf16.msra.mxu1 %v3605_v1  ;;  %v3692_v0 = vld [vmem:[#allocation5 + $0x5a0] ss:$16 sps:$4 sm:$0xff]   ;;  %v3695_v1 = vld [vmem:[#allocation5 + $0x5a8] ss:$16 sps:$4 sm:$0xff]  }
  0xc5   :  { %1371 = vmatprep.subr.bf16.mxu0 %v3610_v2  ;;  %1535 = vmatprep.subr.bf16.mxu1 %v3613_v3  ;;  %v3700_v2 = vld [vmem:[#allocation5 + $0x5c4] ss:$16 sps:$4 sm:$0xff]   ;;  %v3703_v3 = vld [vmem:[#allocation5 + $0x5cc] ss:$16 sps:$4 sm:$0xff]  }
  0xc8   :  { %1372 = vmatpush1.bf16.msra.mxu0 %v3608_v4  ;;  %1536 = vmatpush1.bf16.msra.mxu1 %v3611_v5  ;;  %v3698_v4 = vld [vmem:[#allocation5 + $0x5c0] ss:$16 sps:$4 sm:$0xff]   ;;  %v3701_v5 = vld [vmem:[#allocation5 + $0x5c8] ss:$16 sps:$4 sm:$0xff]  }
  0xc9   :  { %1382 = vmatprep.subr.bf16.mxu0 %v3616_v6  ;;  %1546 = vmatprep.subr.bf16.mxu1 %v3619_v8  ;;  %v3706_v6 = vld [vmem:[#allocation5 + $0x5e4] ss:$16 sps:$4 sm:$0xff]   ;;  %v3704_v8 = vld [vmem:[#allocation5 + $0x5e0] ss:$16 sps:$4 sm:$0xff]  }
  0xcb   :  { %1374 = vmatmul.mubr.bf16.vlgmr.msra.gmra.mrb[0].mxu0 %v93_v10  ;;  %1538 = vmatmul.mubr.bf16.vlgmr.msra.gmra.mrb[0].mxu1 %v93_v10  ;;  %v88_v10 = vld [vmem:[#allocation2 + $0x20] sm:$0xff] }
  0xcc   :  { %1383 = vmatpush1.bf16.msra.mxu0 %v3614_v9  ;;  %1547 = vmatpush1.bf16.msra.mxu1 %v3617_v11  ;;  %v3707_v9 = vld [vmem:[#allocation5 + $0x5e8] ss:$16 sps:$4 sm:$0xff]   ;;  %v3712_v11 = vld [vmem:[#allocation5 + $0x604] ss:$16 sps:$4 sm:$0xff]  }
  0xcd   :  { %1384 = vmatprep.subr.bf16.mxu0 %v3622_v12  ;;  %1548 = vmatprep.subr.bf16.mxu1 %v3625_v13  ;;  %v3715_v12 = vld [vmem:[#allocation5 + $0x60c] ss:$16 sps:$4 sm:$0xff]   ;;  %v3710_v13 = vld [vmem:[#allocation5 + $0x600] ss:$16 sps:$4 sm:$0xff]  }
  0xce   :  { %1414 = vmatprep.mubr.bf16.mxu0 %v96_v15  ;;  %1578 = vmatprep.mubr.bf16.mxu1 %v96_v15  ;;  %v95_v15 = vpack.c.bf16 %v88_v10, %v88_v10  ;;  %v3797_v10 = vld [vmem:[#allocation7 + $0x1a8] ss:$16 sps:$4 sm:$0xff]  }
  0xd0   :  { %1385 = vmatpush1.bf16.msra.mxu0 %v3620_v16  ;;  %1549 = vmatpush1.bf16.msra.mxu1 %v3623_v17  ;;  %v3718_v16 = vld [vmem:[#allocation7 + $0x4] ss:$16 sps:$4 sm:$0xff]   ;;  %v3721_v17 = vld [vmem:[#allocation7 + $0xc] ss:$16 sps:$4 sm:$0xff]  }
  0xd1   :  { %1386 = vmatprep.subr.bf16.mxu0 %v3628_v18  ;;  %1550 = vmatprep.subr.bf16.mxu1 %v3631_v19  ;;  %v4070_v18 = vmov 0   ;;  %v90_v19 = vld [vmem:[#allocation2 + $0x30] sm:$0xff] }
  0xd4   :  { %1387 = vmatpush1.bf16.msra.mxu0 %v3626_v20  ;;  %1551 = vmatpush1.bf16.msra.mxu1 %v3629_v21  ;;  %v3716_v20 = vld [vmem:[#allocation7] ss:$16 sps:$4 sm:$0xff]   ;;  %v3719_v21 = vld [vmem:[#allocation7 + $0x8] ss:$16 sps:$4 sm:$0xff]  }
  0xd5   :  { %1388 = vmatprep.subr.bf16.mxu0 %v3634_v22  ;;  %1552 = vmatprep.subr.bf16.mxu1 %v3637_v23  ;;  %v97_v22 = vpack.c.bf16 %v90_v19, %v90_v19  ;;  %v3724_v23 = vld [vmem:[#allocation7 + $0x24] ss:$16 sps:$4 sm:$0xff]  }
  0xd6   :  { %v3814_v19 = vld [vmem:[#allocation7 + $0x204] ss:$16 sps:$4 sm:$0xff]  }
  0xd8   :  { %1389 = vmatpush1.bf16.msra.mxu0 %v3632_v24  ;;  %1553 = vmatpush1.bf16.msra.mxu1 %v3635_v25  ;;  %v3727_v24 = vld [vmem:[#allocation7 + $0x2c] ss:$16 sps:$4 sm:$0xff]   ;;  %v3722_v25 = vld [vmem:[#allocation7 + $0x20] ss:$16 sps:$4 sm:$0xff]  }
  0xd9   :  { %1390 = vmatprep.subr.bf16.mxu0 %v3640_v26  ;;  %1554 = vmatprep.subr.bf16.mxu1 %v3643_v27  ;;  %v3725_v26 = vld [vmem:[#allocation7 + $0x28] ss:$16 sps:$4 sm:$0xff]   ;;  %v3730_v27 = vld [vmem:[#allocation7 + $0x44] ss:$16 sps:$4 sm:$0xff]  }
  0xdc   :  { %1391 = vmatpush1.bf16.msra.mxu0 %v3638_v28  ;;  %1555 = vmatpush1.bf16.msra.mxu1 %v3641_v29  ;;  %v3733_v28 = vld [vmem:[#allocation7 + $0x4c] ss:$16 sps:$4 sm:$0xff]   ;;  %v3728_v29 = vld [vmem:[#allocation7 + $0x40] ss:$16 sps:$4 sm:$0xff]  }
  0xdd   :  { %1392 = vmatprep.subr.bf16.mxu0 %v3646_v30  ;;  %1556 = vmatprep.subr.bf16.mxu1 %v3649_v31  ;;  %v3731_v30 = vld [vmem:[#allocation7 + $0x48] ss:$16 sps:$4 sm:$0xff]   ;;  %v3736_v31 = vld [vmem:[#allocation7 + $0x64] ss:$16 sps:$4 sm:$0xff]  }
  0xe0   :  { %1393 = vmatpush1.bf16.msra.mxu0 %v3644_v32  ;;  %1557 = vmatpush1.bf16.msra.mxu1 %v3647_v33  ;;  %v3739_v32 = vld [vmem:[#allocation7 + $0x6c] ss:$16 sps:$4 sm:$0xff]   ;;  %v3734_v33 = vld [vmem:[#allocation7 + $0x60] ss:$16 sps:$4 sm:$0xff]  }
  0xe1   :  { %1394 = vmatprep.subr.bf16.mxu0 %v3652_v34  ;;  %1558 = vmatprep.subr.bf16.mxu1 %v3655_v35  ;;  %v3737_v34 = vld [vmem:[#allocation7 + $0x68] ss:$16 sps:$4 sm:$0xff]   ;;  %v3742_v35 = vld [vmem:[#allocation7 + $0x84] ss:$16 sps:$4 sm:$0xff]  }
  0xe4   :  { %1395 = vmatpush1.bf16.msra.mxu0 %v3650_v36  ;;  %1559 = vmatpush1.bf16.msra.mxu1 %v3653_v37  ;;  %v3745_v36 = vld [vmem:[#allocation7 + $0x8c] ss:$16 sps:$4 sm:$0xff]   ;;  %v3740_v37 = vld [vmem:[#allocation7 + $0x80] ss:$16 sps:$4 sm:$0xff]  }
  0xe5   :  { %1396 = vmatprep.subr.bf16.mxu0 %v3658_v38  ;;  %1560 = vmatprep.subr.bf16.mxu1 %v3661_v39  ;;  %v3743_v38 = vld [vmem:[#allocation7 + $0x88] ss:$16 sps:$4 sm:$0xff]   ;;  %v3748_v39 = vld [vmem:[#allocation7 + $0xa4] ss:$16 sps:$4 sm:$0xff]  }
  0xe8   :  { %1397 = vmatpush1.bf16.msra.mxu0 %v3656_v40  ;;  %1561 = vmatpush1.bf16.msra.mxu1 %v3659_v41  ;;  %v3751_v40 = vld [vmem:[#allocation7 + $0xac] ss:$16 sps:$4 sm:$0xff]   ;;  %v3746_v41 = vld [vmem:[#allocation7 + $0xa0] ss:$16 sps:$4 sm:$0xff]  }
  0xe9   :  { %1398 = vmatprep.subr.bf16.mxu0 %v3664_v42  ;;  %1562 = vmatprep.subr.bf16.mxu1 %v3667_v43  ;;  %v3749_v42 = vld [vmem:[#allocation7 + $0xa8] ss:$16 sps:$4 sm:$0xff]   ;;  %v3754_v43 = vld [vmem:[#allocation7 + $0xc4] ss:$16 sps:$4 sm:$0xff]  }
  0xec   :  { %1399 = vmatpush1.bf16.msra.mxu0 %v3662_v44  ;;  %1563 = vmatpush1.bf16.msra.mxu1 %v3665_v45  ;;  %v3757_v44 = vld [vmem:[#allocation7 + $0xcc] ss:$16 sps:$4 sm:$0xff]   ;;  %v3752_v45 = vld [vmem:[#allocation7 + $0xc0] ss:$16 sps:$4 sm:$0xff]  }
  0xed   :  { %1400 = vmatprep.subr.bf16.mxu0 %v3670_v46  ;;  %1564 = vmatprep.subr.bf16.mxu1 %v3673_v47  ;;  %v3755_v46 = vld [vmem:[#allocation7 + $0xc8] ss:$16 sps:$4 sm:$0xff]   ;;  %v3760_v47 = vld [vmem:[#allocation7 + $0xe4] ss:$16 sps:$4 sm:$0xff]  }
  0xf0   :  { %1401 = vmatpush1.bf16.msra.mxu0 %v3668_v48  ;;  %1565 = vmatpush1.bf16.msra.mxu1 %v3671_v49  ;;  %v3763_v48 = vld [vmem:[#allocation7 + $0xec] ss:$16 sps:$4 sm:$0xff]   ;;  %v3758_v49 = vld [vmem:[#allocation7 + $0xe0] ss:$16 sps:$4 sm:$0xff]  }
  0xf1   :  { %1402 = vmatprep.subr.bf16.mxu0 %v3676_v50  ;;  %1566 = vmatprep.subr.bf16.mxu1 %v3679_v51  ;;  %v3761_v50 = vld [vmem:[#allocation7 + $0xe8] ss:$16 sps:$4 sm:$0xff]   ;;  %v3766_v51 = vld [vmem:[#allocation7 + $0x104] ss:$16 sps:$4 sm:$0xff]  }
  0xf4   :  { %1403 = vmatpush1.bf16.msra.mxu0 %v3674_v52  ;;  %1567 = vmatpush1.bf16.msra.mxu1 %v3677_v53  ;;  %v3769_v52 = vld [vmem:[#allocation7 + $0x10c] ss:$16 sps:$4 sm:$0xff]   ;;  %v3764_v53 = vld [vmem:[#allocation7 + $0x100] ss:$16 sps:$4 sm:$0xff]  }
  0xf5   :  { %1404 = vmatprep.subr.bf16.mxu0 %v3682_v54  ;;  %1568 = vmatprep.subr.bf16.mxu1 %v3685_v55  ;;  %v3767_v54 = vld [vmem:[#allocation7 + $0x108] ss:$16 sps:$4 sm:$0xff]   ;;  %v3772_v55 = vld [vmem:[#allocation7 + $0x124] ss:$16 sps:$4 sm:$0xff]  }
  0xf8   :  { %1405 = vmatpush1.bf16.msra.mxu0 %v3680_v56  ;;  %1569 = vmatpush1.bf16.msra.mxu1 %v3683_v57  ;;  %v3775_v56 = vld [vmem:[#allocation7 + $0x12c] ss:$16 sps:$4 sm:$0xff]   ;;  %v3770_v57 = vld [vmem:[#allocation7 + $0x120] ss:$16 sps:$4 sm:$0xff]  }
  0xf9   :  { %1406 = vmatprep.subr.bf16.mxu0 %v3688_v58  ;;  %1570 = vmatprep.subr.bf16.mxu1 %v3691_v59  ;;  %v3773_v58 = vld [vmem:[#allocation7 + $0x128] ss:$16 sps:$4 sm:$0xff]   ;;  %v3778_v59 = vld [vmem:[#allocation7 + $0x144] ss:$16 sps:$4 sm:$0xff]  }
  0xfc   :  { %1407 = vmatpush1.bf16.msra.mxu0 %v3686_v60  ;;  %1571 = vmatpush1.bf16.msra.mxu1 %v3689_v61  ;;  %v3781_v60 = vld [vmem:[#allocation7 + $0x14c] ss:$16 sps:$4 sm:$0xff]   ;;  %v3776_v61 = vld [vmem:[#allocation7 + $0x140] ss:$16 sps:$4 sm:$0xff]  }
  0xfd   :  { %1408 = vmatprep.subr.bf16.mxu0 %v3694_v62  ;;  %1572 = vmatprep.subr.bf16.mxu1 %v3697_v63  ;;  %v3779_v62 = vld [vmem:[#allocation7 + $0x148] ss:$16 sps:$4 sm:$0xff]   ;;  %v3784_v63 = vld [vmem:[#allocation7 + $0x164] ss:$16 sps:$4 sm:$0xff]  }
 0x100   :  { %1409 = vmatpush1.bf16.msra.mxu0 %v3692_v0  ;;  %1573 = vmatpush1.bf16.msra.mxu1 %v3695_v1  ;;  %v3787_v0 = vld [vmem:[#allocation7 + $0x16c] ss:$16 sps:$4 sm:$0xff]   ;;  %v3782_v1 = vld [vmem:[#allocation7 + $0x160] ss:$16 sps:$4 sm:$0xff]  }
 0x101   :  { %1410 = vmatprep.subr.bf16.mxu0 %v3700_v2  ;;  %1574 = vmatprep.subr.bf16.mxu1 %v3703_v3  ;;  %v3785_v2 = vld [vmem:[#allocation7 + $0x168] ss:$16 sps:$4 sm:$0xff]   ;;  %v3790_v3 = vld [vmem:[#allocation7 + $0x184] ss:$16 sps:$4 sm:$0xff]  }
 0x104   :  { %1411 = vmatpush1.bf16.msra.mxu0 %v3698_v4  ;;  %1575 = vmatpush1.bf16.msra.mxu1 %v3701_v5  ;;  %v3793_v4 = vld [vmem:[#allocation7 + $0x18c] ss:$16 sps:$4 sm:$0xff]   ;;  %v3788_v5 = vld [vmem:[#allocation7 + $0x180] ss:$16 sps:$4 sm:$0xff]  }
 0x105   :  { %1412 = vmatprep.subr.bf16.mxu0 %v3706_v6  ;;  %1576 = vmatprep.subr.bf16.mxu1 %v3709_v7  ;;  %v3791_v6 = vld [vmem:[#allocation7 + $0x188] ss:$16 sps:$4 sm:$0xff]   ;;  %v3796_v7 = vld [vmem:[#allocation7 + $0x1a4] ss:$16 sps:$4 sm:$0xff]  }
 0x108   :  { %1413 = vmatpush1.bf16.msra.mxu0 %v3704_v8  ;;  %1577 = vmatpush1.bf16.msra.mxu1 %v3707_v9  ;;  %v3799_v8 = vld [vmem:[#allocation7 + $0x1ac] ss:$16 sps:$4 sm:$0xff]   ;;  %v3794_v9 = vld [vmem:[#allocation7 + $0x1a0] ss:$16 sps:$4 sm:$0xff]  }
 0x109   :  { %1423 = vmatprep.subr.bf16.mxu0 %v3712_v11  ;;  %1587 = vmatprep.subr.bf16.mxu1 %v3715_v12  ;;  %v3802_v11 = vld [vmem:[#allocation7 + $0x1c4] ss:$16 sps:$4 sm:$0xff]   ;;  %v3805_v12 = vld [vmem:[#allocation7 + $0x1cc] ss:$16 sps:$4 sm:$0xff]  }
 0x10b   :  { %1415 = vmatmul.mubr.bf16.vlgmr.msra.gmra.mrb[0].mxu0 %v95_v15  ;;  %1579 = vmatmul.mubr.bf16.vlgmr.msra.gmra.mrb[0].mxu1 %v95_v15  ;;  %v3808_v15 = vld [vmem:[#allocation7 + $0x1e4] ss:$16 sps:$4 sm:$0xff]  }
 0x10c   :  { %1424 = vmatpush1.bf16.msra.mxu0 %v3710_v13  ;;  %1588 = vmatpush1.bf16.msra.mxu1 %v3713_v14  ;;  %v3800_v13 = vld [vmem:[#allocation7 + $0x1c0] ss:$16 sps:$4 sm:$0xff]   ;;  %v3803_v14 = vld [vmem:[#allocation7 + $0x1c8] ss:$16 sps:$4 sm:$0xff]  }
 0x10d   :  { %1455 = vmatprep.mubr.bf16.mxu0 %v4070_v18  ;;  %1619 = vmatprep.mubr.bf16.mxu1 %v4070_v18  ;;  %v3809_v18 = vld [vmem:[#allocation7 + $0x1e8] ss:$16 sps:$4 sm:$0xff]  }
 0x10e   :  { %2426 = vmatprep.subr.bf16.mxu0 %v3718_v16  ;;  %2508 = vmatprep.subr.bf16.mxu1 %v3721_v17  ;;  %v3811_v16 = vld [vmem:[#allocation7 + $0x1ec] ss:$16 sps:$4 sm:$0xff]   ;;  %v3806_v17 = vld [vmem:[#allocation7 + $0x1e0] ss:$16 sps:$4 sm:$0xff]  }
 0x117   :  { %3165 = vmatmul.mubr.msk.bf16.vlgmr.msra.gmra.mrb[0].mxu0 %vm1296_vm0, %v97_v22  ;;  %3166 = vmatmul.mubr.msk.bf16.vlgmr.msra.gmra.mrb[0].mxu1 %vm1296_vm0, %v97_v22 }
 0x118   :  { %2427 = vmatpush1.bf16.msra.mxu0 %v3716_v20  ;;  %2509 = vmatpush1.bf16.msra.mxu1 %v3719_v21  ;;  %v3817_v20 = vld [vmem:[#allocation7 + $0x20c] ss:$16 sps:$4 sm:$0xff]   ;;  %v296_v21 = vlaneseq }
 0x119   :  { %2428 = vmatprep.subr.bf16.mxu0 %v3724_v23  ;;  %2510 = vmatprep.subr.bf16.mxu1 %v3727_v24  ;;  %v4172_v24 = vld [vmem:[%s4220_s2] sm:$0xf] }
 0x11a   :  { %v4166_v22 = vshrl.u32 %v296_v21, 7  ;;  %v3874_v21 = vld [vmem:[#allocation7 + $0x344] ss:$16 sps:$4 sm:$0xff]  }
 0x11c   :  { %2429 = vmatpush1.bf16.msra.mxu0 %v3722_v25  ;;  %2511 = vmatpush1.bf16.msra.mxu1 %v3725_v26  ;;  %v298_v23 = vsub.s32 0, %v4166_v22  ;;  %v302_v25 = vsub.s32 1, %v4166_v22  ;;  %v310_v26 = vsub.s32 3, %v4166_v22 }
 0x11d   :  { %2430 = vmatprep.subr.bf16.mxu0 %v3730_v27  ;;  %2512 = vmatprep.subr.bf16.mxu1 %v3733_v28 }
 0x11e   :  { %v299_v27 = vrot.slane %v4172_v24, %v298_v23  ;;  %v303_v28 = vrot.slane %v4172_v24, %v302_v25 }
 0x120   :  { %2431 = vmatpush1.bf16.msra.mxu0 %v3728_v29  ;;  %2513 = vmatpush1.bf16.msra.mxu1 %v3731_v30  ;;  %v311_v29 = vrot.slane %v4172_v24, %v310_v26 }
 0x121   :  { %2432 = vmatprep.subr.bf16.mxu0 %v3736_v31  ;;  %2514 = vmatprep.subr.bf16.mxu1 %v3739_v32 }
 0x124   :  { %2433 = vmatpush1.bf16.msra.mxu0 %v3734_v33  ;;  %2515 = vmatpush1.bf16.msra.mxu1 %v3737_v34 }
 0x125   :  { %2434 = vmatprep.subr.bf16.mxu0 %v3742_v35  ;;  %2516 = vmatprep.subr.bf16.mxu1 %v3745_v36 }
 0x128   :  { %2435 = vmatpush1.bf16.msra.mxu0 %v3740_v37  ;;  %2517 = vmatpush1.bf16.msra.mxu1 %v3743_v38 }
 0x129   :  { %2436 = vmatprep.subr.bf16.mxu0 %v3748_v39  ;;  %2518 = vmatprep.subr.bf16.mxu1 %v3751_v40 }
 0x12c   :  { %2437 = vmatpush1.bf16.msra.mxu0 %v3746_v41  ;;  %2519 = vmatpush1.bf16.msra.mxu1 %v3749_v42 }
 0x12d   :  { %2438 = vmatprep.subr.bf16.mxu0 %v3754_v43  ;;  %2520 = vmatprep.subr.bf16.mxu1 %v3757_v44 }
 0x130   :  { %2439 = vmatpush1.bf16.msra.mxu0 %v3752_v45  ;;  %2521 = vmatpush1.bf16.msra.mxu1 %v3755_v46  ;;  %v3812_v45 = vld [vmem:[#allocation7 + $0x200] ss:$16 sps:$4 sm:$0xff]   ;;  %v3815_v46 = vld [vmem:[#allocation7 + $0x208] ss:$16 sps:$4 sm:$0xff]  }
 0x131   :  { %2440 = vmatprep.subr.bf16.mxu0 %v3760_v47  ;;  %2522 = vmatprep.subr.bf16.mxu1 %v3763_v48  ;;  %v3820_v48 = vld [vmem:[#allocation7 + $0x224] ss:$16 sps:$4 sm:$0xff]  }
 0x134   :  { %2441 = vmatpush1.bf16.msra.mxu0 %v3758_v49  ;;  %2523 = vmatpush1.bf16.msra.mxu1 %v3761_v50  ;;  %v3823_v49 = vld [vmem:[#allocation7 + $0x22c] ss:$16 sps:$4 sm:$0xff]  }
 0x135   :  { %2442 = vmatprep.subr.bf16.mxu0 %v3766_v51  ;;  %2524 = vmatprep.subr.bf16.mxu1 %v3769_v52  ;;  %v3818_v51 = vld [vmem:[#allocation7 + $0x220] ss:$16 sps:$4 sm:$0xff]   ;;  %v3821_v52 = vld [vmem:[#allocation7 + $0x228] ss:$16 sps:$4 sm:$0xff]  }
 0x138   :  { %2443 = vmatpush1.bf16.msra.mxu0 %v3764_v53  ;;  %2525 = vmatpush1.bf16.msra.mxu1 %v3767_v54  ;;  %v3826_v53 = vld [vmem:[#allocation7 + $0x244] ss:$16 sps:$4 sm:$0xff]   ;;  %v3829_v54 = vld [vmem:[#allocation7 + $0x24c] ss:$16 sps:$4 sm:$0xff]  }
 0x139   :  { %2444 = vmatprep.subr.bf16.mxu0 %v3772_v55  ;;  %2526 = vmatprep.subr.bf16.mxu1 %v3775_v56  ;;  %v3824_v55 = vld [vmem:[#allocation7 + $0x240] ss:$16 sps:$4 sm:$0xff]   ;;  %v3827_v56 = vld [vmem:[#allocation7 + $0x248] ss:$16 sps:$4 sm:$0xff]  }
 0x13c   :  { %2445 = vmatpush1.bf16.msra.mxu0 %v3770_v57  ;;  %2527 = vmatpush1.bf16.msra.mxu1 %v3773_v58  ;;  %v3832_v57 = vld [vmem:[#allocation7 + $0x264] ss:$16 sps:$4 sm:$0xff]   ;;  %v3835_v58 = vld [vmem:[#allocation7 + $0x26c] ss:$16 sps:$4 sm:$0xff]  }
 0x13d   :  { %2446 = vmatprep.subr.bf16.mxu0 %v3778_v59  ;;  %2528 = vmatprep.subr.bf16.mxu1 %v3781_v60  ;;  %v3830_v59 = vld [vmem:[#allocation7 + $0x260] ss:$16 sps:$4 sm:$0xff]   ;;  %v3833_v60 = vld [vmem:[#allocation7 + $0x268] ss:$16 sps:$4 sm:$0xff]  }
 0x140   :  { %2447 = vmatpush1.bf16.msra.mxu0 %v3776_v61  ;;  %2529 = vmatpush1.bf16.msra.mxu1 %v3779_v62  ;;  %v3838_v61 = vld [vmem:[#allocation7 + $0x284] ss:$16 sps:$4 sm:$0xff]   ;;  %v3841_v62 = vld [vmem:[#allocation7 + $0x28c] ss:$16 sps:$4 sm:$0xff]  }
 0x141   :  { %2448 = vmatprep.subr.bf16.mxu0 %v3784_v63  ;;  %2530 = vmatprep.subr.bf16.mxu1 %v3787_v0  ;;  %v3836_v63 = vld [vmem:[#allocation7 + $0x280] ss:$16 sps:$4 sm:$0xff]   ;;  %v3839_v0 = vld [vmem:[#allocation7 + $0x288] ss:$16 sps:$4 sm:$0xff]  }
 0x144   :  { %2449 = vmatpush1.bf16.msra.mxu0 %v3782_v1  ;;  %2531 = vmatpush1.bf16.msra.mxu1 %v3785_v2  ;;  %v3844_v1 = vld [vmem:[#allocation7 + $0x2a4] ss:$16 sps:$4 sm:$0xff]   ;;  %v3847_v2 = vld [vmem:[#allocation7 + $0x2ac] ss:$16 sps:$4 sm:$0xff]  }
 0x145   :  { %2450 = vmatprep.subr.bf16.mxu0 %v3790_v3  ;;  %2532 = vmatprep.subr.bf16.mxu1 %v3793_v4  ;;  %v3842_v3 = vld [vmem:[#allocation7 + $0x2a0] ss:$16 sps:$4 sm:$0xff]   ;;  %v3845_v4 = vld [vmem:[#allocation7 + $0x2a8] ss:$16 sps:$4 sm:$0xff]  }
 0x148   :  { %2451 = vmatpush1.bf16.msra.mxu0 %v3788_v5  ;;  %2533 = vmatpush1.bf16.msra.mxu1 %v3791_v6  ;;  %v3850_v5 = vld [vmem:[#allocation7 + $0x2c4] ss:$16 sps:$4 sm:$0xff]   ;;  %v3853_v6 = vld [vmem:[#allocation7 + $0x2cc] ss:$16 sps:$4 sm:$0xff]  }
 0x149   :  { %2452 = vmatprep.subr.bf16.mxu0 %v3796_v7  ;;  %2534 = vmatprep.subr.bf16.mxu1 %v3799_v8  ;;  %v3848_v7 = vld [vmem:[#allocation7 + $0x2c0] ss:$16 sps:$4 sm:$0xff]   ;;  %v3851_v8 = vld [vmem:[#allocation7 + $0x2c8] ss:$16 sps:$4 sm:$0xff]  }
 0x14c   :  { %2453 = vmatpush1.bf16.msra.mxu0 %v3794_v9  ;;  %2535 = vmatpush1.bf16.msra.mxu1 %v3797_v10  ;;  %v3856_v9 = vld [vmem:[#allocation7 + $0x2e4] ss:$16 sps:$4 sm:$0xff]   ;;  %v3859_v10 = vld [vmem:[#allocation7 + $0x2ec] ss:$16 sps:$4 sm:$0xff]  }
 0x14d   :  { %2454 = vmatprep.subr.bf16.mxu0 %v3802_v11  ;;  %2536 = vmatprep.subr.bf16.mxu1 %v3805_v12  ;;  %v3854_v11 = vld [vmem:[#allocation7 + $0x2e0] ss:$16 sps:$4 sm:$0xff]   ;;  %v3857_v12 = vld [vmem:[#allocation7 + $0x2e8] ss:$16 sps:$4 sm:$0xff]  }
 0x150   :  { %2455 = vmatpush1.bf16.msra.mxu0 %v3800_v13  ;;  %2537 = vmatpush1.bf16.msra.mxu1 %v3803_v14  ;;  %v3862_v13 = vld [vmem:[#allocation7 + $0x304] ss:$16 sps:$4 sm:$0xff]   ;;  %v3865_v14 = vld [vmem:[#allocation7 + $0x30c] ss:$16 sps:$4 sm:$0xff]  }
 0x151   :  { %2456 = vmatprep.subr.bf16.mxu0 %v3808_v15  ;;  %2538 = vmatprep.subr.bf16.mxu1 %v3811_v16  ;;  %v3860_v15 = vld [vmem:[#allocation7 + $0x300] ss:$16 sps:$4 sm:$0xff]   ;;  %v3863_v16 = vld [vmem:[#allocation7 + $0x308] ss:$16 sps:$4 sm:$0xff]  }
 0x154   :  { %2457 = vmatpush1.bf16.msra.mxu0 %v3806_v17  ;;  %2539 = vmatpush1.bf16.msra.mxu1 %v3809_v18  ;;  %v3868_v17 = vld [vmem:[#allocation7 + $0x324] ss:$16 sps:$4 sm:$0xff]   ;;  %v3871_v18 = vld [vmem:[#allocation7 + $0x32c] ss:$16 sps:$4 sm:$0xff]  }
 0x155   :  { %2467 = vmatprep.subr.bf16.mxu0 %v3814_v19  ;;  %2549 = vmatprep.subr.bf16.mxu1 %v3817_v20  ;;  %v3866_v19 = vld [vmem:[#allocation7 + $0x320] ss:$16 sps:$4 sm:$0xff]   ;;  %v3869_v20 = vld [vmem:[#allocation7 + $0x328] ss:$16 sps:$4 sm:$0xff]  }
 0x1ea   :  { %v1457_v30 = vpop.f32.mrb[0].mxu0  ;;  %v4185_v31 = vpop.f32.mrb[0].mxu1 }
 0x1eb   :  { %v3372_v32 = vadd.f32 %v1457_v30, %v299_v27  ;;  %v1459_v33 = vpop.f32.mrb[1].mxu0  ;;  %v1623_v34 = vpop.f32.mrb[1].mxu1  ;;  %v3877_v27 = vld [vmem:[#allocation7 + $0x34c] ss:$16 sps:$4 sm:$0xff]   ;;  %v3880_v30 = vld [vmem:[#allocation7 + $0x364] ss:$16 sps:$4 sm:$0xff]  }
 0x1ec   :  { %v3373_v35 = vadd.f32 %v1459_v33, %v303_v28  ;;  %v3375_v36 = vadd.f32 %v1623_v34, %v311_v29  ;;  %v1461_v37 = vpop.f32.mrb[2].mxu0  ;;  %v1625_v38 = vpop.f32.mrb[2].mxu1  ;;  %v3872_v28 = vld [vmem:[#allocation7 + $0x340] ss:$16 sps:$4 sm:$0xff]   ;;  %v3875_v29 = vld [vmem:[#allocation7 + $0x348] ss:$16 sps:$4 sm:$0xff]  }
 0x1ed   :  { %v1628_v39 = vmax.f32 %v3372_v32, 0.0  ;;  %v1462_v40 = vpop.f32.mrb[3].mxu0  ;;  %v1626_v41 = vpop.f32.mrb[3].mxu1  ;;  %v3883_v32 = vld [vmem:[#allocation7 + $0x36c] ss:$16 sps:$4 sm:$0xff]  }
 0x1ee   :  { %v1629_v42 = vmax.f32 %v3373_v35, 0.0  ;;  %v1631_v43 = vmax.f32 %v3375_v36, 0.0  ;;  %v3878_v33 = vld [vmem:[#allocation7 + $0x360] ss:$16 sps:$4 sm:$0xff]   ;;  %v3881_v34 = vld [vmem:[#allocation7 + $0x368] ss:$16 sps:$4 sm:$0xff]  }
 0x1ef   :  { %v1632_v47 = vpack.c.bf16 %v1628_v39, %v1628_v39  ;;  %v3886_v35 = vld [vmem:[#allocation7 + $0x384] ss:$16 sps:$4 sm:$0xff]   ;;  %v3889_v36 = vld [vmem:[#allocation7 + $0x38c] ss:$16 sps:$4 sm:$0xff]   ;;  %v3884_v37 = vld [vmem:[#allocation7 + $0x380] ss:$16 sps:$4 sm:$0xff]  }
 0x1f0   :  { %v1633_v44 = vpack.c.bf16 %v1629_v42, %v1629_v42  ;;  %v1635_v50 = vpack.c.bf16 %v1631_v43, %v1631_v43  ;;  %v3887_v38 = vld [vmem:[#allocation7 + $0x388] ss:$16 sps:$4 sm:$0xff]   ;;  %v306_v39 = vsub.s32 2, %v4166_v22  ;;  %v3892_v40 = vld [vmem:[#allocation7 + $0x3a4] ss:$16 sps:$4 sm:$0xff]  }
 0x1f1   :  { %v3895_v41 = vld [vmem:[#allocation7 + $0x3ac] ss:$16 sps:$4 sm:$0xff]   ;;  %v3890_v42 = vld [vmem:[#allocation7 + $0x3a0] ss:$16 sps:$4 sm:$0xff]   ;;  %v3893_v43 = vld [vmem:[#allocation7 + $0x3a8] ss:$16 sps:$4 sm:$0xff]  }
 0x1f2   :  { %2458 = vmatprep.mubr.bf16.mxu0 %v1633_v44  ;;  %2540 = vmatprep.mubr.bf16.mxu1 %v1633_v44  ;;  %v307_v44 = vrot.slane %v4172_v24, %v306_v39  ;;  %v3908_v24 = vld [vmem:[#allocation8 + $0x40] sm:$0xff]  }
 0x1f3   :  { %2459 = vmatmul.mubr.bf16.vlgmr.msra.gmra.mrb[4].mxu0 %v1632_v47  ;;  %2541 = vmatmul.mubr.bf16.vlgmr.msra.gmra.mrb[4].mxu1 %v1632_v47  ;;  %v3896_v47 = vld [vmem:[#allocation7 + $0x3c0] ss:$16 sps:$4 sm:$0xff]  }
 0x1f4   :  { %2468 = vmatpush1.bf16.msra.mxu0 %v3812_v45  ;;  %2550 = vmatpush1.bf16.msra.mxu1 %v3815_v46  ;;  %v3898_v45 = vld [vmem:[#allocation7 + $0x3c4] ss:$16 sps:$4 sm:$0xff]   ;;  %v3901_v46 = vld [vmem:[#allocation7 + $0x3cc] ss:$16 sps:$4 sm:$0xff]  }
 0x1f5   :  { %2499 = vmatprep.mubr.bf16.mxu0 %v1635_v50  ;;  %2581 = vmatprep.mubr.bf16.mxu1 %v1635_v50  ;;  %v3904_v50 = vld [vmem:[#allocation7 + $0x3e4] ss:$16 sps:$4 sm:$0xff]  }
 0x1f6   :  { %2469 = vmatprep.subr.bf16.mxu0 %v3820_v48  ;;  %2551 = vmatprep.subr.bf16.mxu1 %v3823_v49  ;;  %v3899_v48 = vld [vmem:[#allocation7 + $0x3c8] ss:$16 sps:$4 sm:$0xff]   ;;  %v3374_v49 = vadd.f32 %v4185_v31, %v307_v44 }
 0x1f7   :  { %v3912_v31 = vld [vmem:[#allocation8 + $0x48] sm:$0xff]  }
 0x1f8   :  { %2470 = vmatpush1.bf16.msra.mxu0 %v3818_v51  ;;  %2552 = vmatpush1.bf16.msra.mxu1 %v3821_v52  ;;  %v3907_v51 = vld [vmem:[#allocation7 + $0x3ec] ss:$16 sps:$4 sm:$0xff]   ;;  %v3902_v52 = vld [vmem:[#allocation7 + $0x3e0] ss:$16 sps:$4 sm:$0xff]  }
 0x1f9   :  { %2471 = vmatprep.subr.bf16.mxu0 %v3826_v53  ;;  %2553 = vmatprep.subr.bf16.mxu1 %v3829_v54  ;;  %v3905_v53 = vld [vmem:[#allocation7 + $0x3e8] ss:$16 sps:$4 sm:$0xff]   ;;  %v1630_v54 = vmax.f32 %v3374_v49, 0.0 }
 0x1fc   :  { %2472 = vmatpush1.bf16.msra.mxu0 %v3824_v55  ;;  %2554 = vmatpush1.bf16.msra.mxu1 %v3827_v56  ;;  %v3909_v55 = vld [vmem:[#allocation8 + $0xc0] sm:$0xff]  }
 0x1fd   :  { %2473 = vmatprep.subr.bf16.mxu0 %v3832_v57  ;;  %2555 = vmatprep.subr.bf16.mxu1 %v3835_v58  ;;  %v3910_v56 = vld [vmem:[#allocation8] sm:$0xff]   ;;  %v1634_v58 = vpack.c.bf16 %v1630_v54, %v1630_v54 }
 0x1fe   :  { %v3911_v57 = vld [vmem:[#allocation8 + $0x80] sm:$0xff]  }
 0x200   :  { %2474 = vmatpush1.bf16.msra.mxu0 %v3830_v59  ;;  %2556 = vmatpush1.bf16.msra.mxu1 %v3833_v60  ;;  %v3913_v59 = vld [vmem:[#allocation8 + $0xc8] sm:$0xff]  }
 0x201   :  { %2475 = vmatprep.subr.bf16.mxu0 %v3838_v61  ;;  %2557 = vmatprep.subr.bf16.mxu1 %v3841_v62  ;;  %v3914_v60 = vld [vmem:[#allocation8 + $0x8] sm:$0xff]   ;;  %v3916_v62 = vld [vmem:[#allocation8 + $0x50] sm:$0xff]  }
 0x202   :  { %v3915_v61 = vld [vmem:[#allocation8 + $0x88] sm:$0xff]  }
 0x204   :  { %2476 = vmatpush1.bf16.msra.mxu0 %v3836_v63  ;;  %2558 = vmatpush1.bf16.msra.mxu1 %v3839_v0  ;;  %v3917_v63 = vld [vmem:[#allocation8 + $0xd0] sm:$0xff]  }
 0x205   :  { %2477 = vmatprep.subr.bf16.mxu0 %v3844_v1  ;;  %2559 = vmatprep.subr.bf16.mxu1 %v3847_v2  ;;  %v3918_v0 = vld [vmem:[#allocation8 + $0x10] sm:$0xff]   ;;  %v3920_v2 = vld [vmem:[#allocation8 + $0x58] sm:$0xff]  }
 0x206   :  { %v3919_v1 = vld [vmem:[#allocation8 + $0x90] sm:$0xff]  }
 0x208   :  { %2478 = vmatpush1.bf16.msra.mxu0 %v3842_v3  ;;  %2560 = vmatpush1.bf16.msra.mxu1 %v3845_v4  ;;  %v3921_v3 = vld [vmem:[#allocation8 + $0xd8] sm:$0xff]  }
 0x209   :  { %2479 = vmatprep.subr.bf16.mxu0 %v3850_v5  ;;  %2561 = vmatprep.subr.bf16.mxu1 %v3853_v6  ;;  %v3922_v4 = vld [vmem:[#allocation8 + $0x18] sm:$0xff]   ;;  %v3924_v6 = vld [vmem:[#allocation8 + $0x60] sm:$0xff]  }
 0x20a   :  { %v3923_v5 = vld [vmem:[#allocation8 + $0x98] sm:$0xff]  }
 0x20c   :  { %2480 = vmatpush1.bf16.msra.mxu0 %v3848_v7  ;;  %2562 = vmatpush1.bf16.msra.mxu1 %v3851_v8  ;;  %v3925_v7 = vld [vmem:[#allocation8 + $0xe0] sm:$0xff]  }
 0x20d   :  { %2481 = vmatprep.subr.bf16.mxu0 %v3856_v9  ;;  %2563 = vmatprep.subr.bf16.mxu1 %v3859_v10  ;;  %v3926_v8 = vld [vmem:[#allocation8 + $0x20] sm:$0xff]   ;;  %v3928_v10 = vld [vmem:[#allocation8 + $0x68] sm:$0xff]  }
 0x20e   :  { %v3927_v9 = vld [vmem:[#allocation8 + $0xa0] sm:$0xff]  }
 0x210   :  { %2482 = vmatpush1.bf16.msra.mxu0 %v3854_v11  ;;  %2564 = vmatpush1.bf16.msra.mxu1 %v3857_v12  ;;  %v3929_v11 = vld [vmem:[#allocation8 + $0xe8] sm:$0xff]  }
 0x211   :  { %2483 = vmatprep.subr.bf16.mxu0 %v3862_v13  ;;  %2565 = vmatprep.subr.bf16.mxu1 %v3865_v14  ;;  %v3930_v12 = vld [vmem:[#allocation8 + $0x28] sm:$0xff]   ;;  %v3932_v14 = vld [vmem:[#allocation8 + $0x70] sm:$0xff]  }
 0x212   :  { %v3931_v13 = vld [vmem:[#allocation8 + $0xa8] sm:$0xff]  }
 0x214   :  { %2484 = vmatpush1.bf16.msra.mxu0 %v3860_v15  ;;  %2566 = vmatpush1.bf16.msra.mxu1 %v3863_v16  ;;  %v3933_v15 = vld [vmem:[#allocation8 + $0xf0] sm:$0xff]  }
 0x215   :  { %2485 = vmatprep.subr.bf16.mxu0 %v3868_v17  ;;  %2567 = vmatprep.subr.bf16.mxu1 %v3871_v18  ;;  %v3934_v16 = vld [vmem:[#allocation8 + $0x30] sm:$0xff]   ;;  %v3936_v18 = vld [vmem:[#allocation8 + $0x78] sm:$0xff]  }
 0x216   :  { %v3935_v17 = vld [vmem:[#allocation8 + $0xb0] sm:$0xff]  }
 0x218   :  { %2486 = vmatpush1.bf16.msra.mxu0 %v3866_v19  ;;  %2568 = vmatpush1.bf16.msra.mxu1 %v3869_v20  ;;  %v3937_v19 = vld [vmem:[#allocation8 + $0xf8] sm:$0xff]  }
 0x219   :  { %2487 = vmatprep.subr.bf16.mxu0 %v3874_v21  ;;  %2569 = vmatprep.subr.bf16.mxu1 %v3877_v27  ;;  %v3938_v20 = vld [vmem:[#allocation8 + $0x38] sm:$0xff]   ;;  %v1764_v27 = vld [vmem:[%s4222_s4] sm:$0xf] }
 0x21a   :  { %v3939_v21 = vld [vmem:[#allocation8 + $0xb8] sm:$0xff]  }
 0x21c   :  { %2488 = vmatpush1.bf16.msra.mxu0 %v3872_v28  ;;  %2570 = vmatpush1.bf16.msra.mxu1 %v3875_v29  ;;  %v1769_v28 = vrot.slane %v1764_v27, %v298_v23  ;;  %v1777_v29 = vrot.slane %v1764_v27, %v306_v39 }
 0x21d   :  { %2489 = vmatprep.subr.bf16.mxu0 %v3880_v30  ;;  %2571 = vmatprep.subr.bf16.mxu1 %v3883_v32  ;;  %v1773_v30 = vrot.slane %v1764_v27, %v302_v25  ;;  %v1781_v32 = vrot.slane %v1764_v27, %v310_v26 }
 0x220   :  { %2490 = vmatpush1.bf16.msra.mxu0 %v3878_v33  ;;  %2572 = vmatpush1.bf16.msra.mxu1 %v3881_v34 }
 0x221   :  { %2491 = vmatprep.subr.bf16.mxu0 %v3886_v35  ;;  %2573 = vmatprep.subr.bf16.mxu1 %v3889_v36 }
 0x224   :  { %2492 = vmatpush1.bf16.msra.mxu0 %v3884_v37  ;;  %2574 = vmatpush1.bf16.msra.mxu1 %v3887_v38 }
 0x225   :  { %2493 = vmatprep.subr.bf16.mxu0 %v3892_v40  ;;  %2575 = vmatprep.subr.bf16.mxu1 %v3895_v41 }
 0x228   :  { %2494 = vmatpush1.bf16.msra.mxu0 %v3890_v42  ;;  %2576 = vmatpush1.bf16.msra.mxu1 %v3893_v43 }
 0x229   :  { %2495 = vmatprep.subr.bf16.mxu0 %v3898_v45  ;;  %2577 = vmatprep.subr.bf16.mxu1 %v3901_v46 }
 0x22c   :  { %2496 = vmatpush1.bf16.msra.mxu0 %v3896_v47  ;;  %2578 = vmatpush1.bf16.msra.mxu1 %v3899_v48 }
 0x22d   :  { %2497 = vmatprep.subr.bf16.mxu0 %v3904_v50  ;;  %2579 = vmatprep.subr.bf16.mxu1 %v3907_v51  ;;  %v3295_v51 = vld [vmem:[%s4224_s6] ss:$0 sm:$0xff]  ;;  %s4071_s6 = smov [#allocation10]  }
 0x22e   :  { %s2958_s29 = sshll.u32 %s4071_s6, 4  ;;  %s2959_s29 = int_to_ptr.vmem [resolvable:$true] %s2958_s29 }
 0x22f   :  { %s4032_s30 = scalar_lea.vmem %s2959_s29, 128  ;;  %p4037_p5 = scmp.lt.s32.totalorder %s2959_s29, %s2959_s29 }
 0x230   :  { %2498 = vmatpush1.bf16.msra.mxu0 %v3902_v52  ;;  %2580 = vmatpush1.bf16.msra.mxu1 %v3905_v53  ;;  %p4033_p4 = scmp.ne.s32.totalorder %s2959_s29, %s4032_s30  ;;  %p4038_p6 = scmp.lt.s32.totalorder %s4032_s30, %s4032_s30 }
 0x231   :  { %3328 = vmatprep.subr.bf16.mxu0 %v3908_v24  ;;  %3350 = vmatprep.subr.bf16.mxu1 %v3909_v55 }
 0x232   :  { %p4039_p7 = por %p4038_p6, %p4037_p5 }
 0x233   :  { %2500 = vmatmul.mubr.bf16.vlgmr.msra.gmra.mrb[4].mxu0 %v1634_v58  ;;  %2582 = vmatmul.mubr.bf16.vlgmr.msra.gmra.mrb[4].mxu1 %v1634_v58 }
 0x234   :  { %3329 = vmatpush3.bf16.msra.mxu0 %v3910_v56  ;;  %3351 = vmatpush3.bf16.msra.mxu1 %v3911_v57  ;;  %p4040_p8 = pnand %p4039_p7, %p4033_p4 }
 0x235   :  { %3330 = vmatprep.subr.bf16.mxu0 %v3912_v31  ;;  %3352 = vmatprep.subr.bf16.mxu1 %v3913_v59 }
 0x238   :  { %3331 = vmatpush3.bf16.msra.mxu0 %v3914_v60  ;;  %3353 = vmatpush3.bf16.msra.mxu1 %v3915_v61 }
 0x239   :  { %3332 = vmatprep.subr.bf16.mxu0 %v3916_v62  ;;  %3354 = vmatprep.subr.bf16.mxu1 %v3917_v63 }
 0x23c   :  { %3333 = vmatpush3.bf16.msra.mxu0 %v3918_v0  ;;  %3355 = vmatpush3.bf16.msra.mxu1 %v3919_v1 }
 0x23d   :  { %3334 = vmatprep.subr.bf16.mxu0 %v3920_v2  ;;  %3356 = vmatprep.subr.bf16.mxu1 %v3921_v3 }
 0x240   :  { %3335 = vmatpush3.bf16.msra.mxu0 %v3922_v4  ;;  %3357 = vmatpush3.bf16.msra.mxu1 %v3923_v5 }
 0x241   :  { %3336 = vmatprep.subr.bf16.mxu0 %v3924_v6  ;;  %3358 = vmatprep.subr.bf16.mxu1 %v3925_v7 }
 0x244   :  { %3337 = vmatpush3.bf16.msra.mxu0 %v3926_v8  ;;  %3359 = vmatpush3.bf16.msra.mxu1 %v3927_v9 }
 0x245   :  { %3338 = vmatprep.subr.bf16.mxu0 %v3928_v10  ;;  %3360 = vmatprep.subr.bf16.mxu1 %v3929_v11 }
 0x248   :  { %3339 = vmatpush3.bf16.msra.mxu0 %v3930_v12  ;;  %3361 = vmatpush3.bf16.msra.mxu1 %v3931_v13 }
 0x249   :  { %3340 = vmatprep.subr.bf16.mxu0 %v3932_v14  ;;  %3362 = vmatprep.subr.bf16.mxu1 %v3933_v15 }
 0x24c   :  { %3341 = vmatpush3.bf16.msra.mxu0 %v3934_v16  ;;  %3363 = vmatpush3.bf16.msra.mxu1 %v3935_v17 }
 0x24d   :  { %3342 = vmatprep.subr.bf16.mxu0 %v3936_v18  ;;  %3364 = vmatprep.subr.bf16.mxu1 %v3937_v19 }
 0x250   :  { %3343 = vmatpush3.bf16.msra.mxu0 %v3938_v20  ;;  %3365 = vmatpush3.bf16.msra.mxu1 %v3939_v21 }
 0x306   :  { %v2501_v33 = vpop.f32.mrb[4].mxu0  ;;  %v2583_v34 = vpop.f32.mrb[4].mxu1 }
 0x307   :  { %v3376_v35 = vadd.f32 %v2501_v33, %v1769_v28  ;;  %v3378_v36 = vadd.f32 %v2583_v34, %v1777_v29  ;;  %v2503_v37 = vpop.f32.mrb[5].mxu0  ;;  %v2585_v38 = vpop.f32.mrb[5].mxu1 }
 0x308   :  { %v3377_v40 = vadd.f32 %v2503_v37, %v1773_v30  ;;  %v3379_v41 = vadd.f32 %v2585_v38, %v1781_v32  ;;  %v2505_v42 = vpop.f32.mrb[6].mxu0  ;;  %v2587_v43 = vpop.f32.mrb[6].mxu1 }
 0x309   :  { %v2590_v23 = vmax.f32 %v3376_v35, 0.0  ;;  %v2592_v44 = vmax.f32 %v3378_v36, 0.0  ;;  %v2506_v45 = vpop.f32.mrb[7].mxu0  ;;  %v2588_v39 = vpop.f32.mrb[7].mxu1 }
 0x30a   :  { %v2591_v46 = vmax.f32 %v3377_v40, 0.0  ;;  %v2593_v47 = vmax.f32 %v3379_v41, 0.0 }
 0x30b   :  { %v2594_v22 = vpack.c.bf16 %v2590_v23, %v2590_v23  ;;  %v2596_v26 = vpack.c.bf16 %v2592_v44, %v2592_v44 }
 0x30c   :  { %v2595_v25 = vpack.c.bf16 %v2591_v46, %v2591_v46  ;;  %v2597_v48 = vpack.c.bf16 %v2593_v47, %v2593_v47 }
 0x30e   :  { %2893 = vmatprep.mubr.bf16.mxu0 %v2595_v25  ;;  %2933 = vmatprep.mubr.bf16.mxu1 %v2597_v48 }
 0x30f   :  { %2894 = vmatmul.mubr.bf16.vlgmr.msra.gmra.mrb[8].mxu0 %v2594_v22  ;;  %2934 = vmatmul.mubr.bf16.vlgmr.msra.gmra.mrb[8].mxu1 %v2596_v26 }
 0x3e2   :  { %v3344_v49 = vpop.f32.mrb[8].mxu0  ;;  %v3366_v50 = vpop.f32.mrb[8].mxu1 }
 0x3e3   :  { %v3345_v52 = vpop.f32.mrb[9].mxu0  ;;  %v3367_v53 = vpop.f32.mrb[9].mxu1 }
 0x3e4   :  { %v3346_v54 = vadd.f32 %v3345_v52, %v3344_v49  ;;  %v3368_v24 = vadd.f32 %v3367_v53, %v3366_v50  ;;  %v3347_v55 = vpop.f32.mrb[10].mxu0  ;;  %v3369_v56 = vpop.f32.mrb[10].mxu1 }
 0x3e5   :  { %v3348_v57 = vpop.f32.mrb[11].mxu0  ;;  %v3370_v58 = vpop.f32.mrb[11].mxu1 }
 0x3e6   :  { %v2896_v31 = vadd.f32 %v3346_v54, %v3295_v51 }
 0x3e8   :  { %v2936_v59 = vadd.f32 %v3368_v24, %v2896_v31 }
 0x3ea   :  { %2941 = vmax.xlane.f32.xlu0 %v2936_v59 }
 0x477   :  { %v2942_v60 = vpop.xlane.xlu0 %2941 }
 0x478   :  { %v2943_v61 = vsub.f32 %v2936_v59, %v2942_v60 }
 0x47a   :  { %v2944_v62 = vmul.f32 1.442695, %v2943_v61 }
 0x47c   :  { %3940 = vpow2.f32 %v2944_v62 }
 0x486   :  { %v3941_v63 = vpop.eup %3940 }
 0x487   :  { %2946 = vadd.xlane.f32.xlu0 %v3941_v63 }
 0x514   :  { %v2947_v0 = vpop.xlane.xlu0 %2946 }
 0x515   :  { %3942 = vlog2.f32 %v2947_v0 }
 0x51f   :  { %v3943_v1 = vpop.eup %3942 }
 0x520   :  { %v2949_v2 = vmul.f32 0.6931472, %v3943_v1 }
 0x522   :  { %v2950_v3 = vsub.f32 %v2943_v61, %v2949_v2 }
 0x524   :  { %2951 = vst [vmem:[#allocation10] sm:$0xff] %v2950_v3 }
 0x525   :  { %4043 = shalt.err (!%p4040_p8)
}
 0x526   :  { %s4044_s10 = scalar_lea.hbm %s4225_s7, 128 }
 0x527   :  { %p4045_p9 = scmp.ne.s32.totalorder %s4225_s7, %s4044_s10  ;;  %p4048_p10 = scmp.lt.u32.totalorder %s4044_s10, %s4225_s7 }
 0x529   :  { %p4050_p11 = pnand %p4048_p10, %p4045_p9 }
 0x52b   :  { %4053 = shalt.err (!%p4050_p11)
}
 0x52c   :  { %2961 = dma.vmem_to_hbm [thread:$0]  %s2959_s29, 128, %s4225_s7, [#allocation4]  }
 0x52d   :  { %4060 = dma.done.wait [#allocation4], 128  }
 0x52e   :  { %4061 = vsyncadd [#allocation4], 4294967168 }
 0x52f   :  { %2965 = vsyncpa [#allocation3], 1 }
 0x530   :  { %2966 = vsyncpa [#allocation6], 1 }
 0x531   :  { %2967 = vsyncpa [#allocation9], 1 }
 0x532   :  { %2968 = vsyncpa [#allocation4], 1 }

</bundles_post_ra>
